<compile_context>
chip_gen: v7x
topology: tpu7x:2x2x1
jax: 0.10.0
libtpu: 0.0.40
codegen_flags: <defaults>
</compile_context>

<pallas_src>
import functools

import jax
import jax.numpy as jnp
from jax import lax
from jax.experimental import pallas as pl
from jax.experimental.pallas import tpu as pltpu


def _round_up(x, m):
    return ((x + m - 1) // m) * m


def _layer_loss_kernel(x_ref, w_ref, b_ref, y_ref, rec_ref, sim_ref,
                       rec_acc, sim_acc, *, tn, num_inner, n_rows,
                       need_mask, use_l2):
    i = pl.program_id(1)

    @pl.when(i == 0)
    def _():
        rec_acc[...] = jnp.zeros_like(rec_acc)
        sim_acc[...] = jnp.zeros_like(sim_acc)

    # Feed the MXU in the stored dtype (bf16 inputs -> bf16 MXU rate, half the
    # DMA bytes); all elementwise/reduction math is done in f32.
    x = x_ref[...]                                 # (tn, Dsp)
    w = w_ref[...]                                 # (Dsp, Dtp)
    b = b_ref[...]                                 # (1, Dtp)  already f32
    y = y_ref[...].astype(jnp.float32)             # (tn, Dtp)

    p = jnp.dot(x, w, preferred_element_type=jnp.float32) + b   # (tn, Dtp) f32

    # Per-row sums (needed by the cosine either way).
    dotpy = jnp.sum(p * y, axis=-1, keepdims=True)               # (tn, 1)
    sq_p = jnp.sum(p * p, axis=-1, keepdims=True)                # (tn, 1)
    sq_y = jnp.sum(y * y, axis=-1, keepdims=True)                # (tn, 1)

    # Cosine similarity (PyTorch eps=1e-8 clamps the norms); rsqrt on the EUP.
    eps2 = jnp.float32(1e-16)                                    # eps**2
    cos = dotpy * lax.rsqrt(jnp.maximum(sq_p, eps2)) \
                * lax.rsqrt(jnp.maximum(sq_y, eps2))
    # -logsigmoid(cos) == softplus(-cos) == logaddexp(0, -cos)
    sim_rows = jnp.logaddexp(jnp.float32(0.0), -cos)             # (tn, 1)

    if use_l2:
        # sum_dt (p - y)^2 from the already-computed row sums.
        # NOTE: mild cancellation risk when p ~= y (acceptable for a loss).
        rec_vals = sq_p - 2.0 * dotpy + sq_y                     # (tn, 1)
    else:
        rec_vals = jnp.abs(p - y)                                # (tn, Dtp)

    def _accum(rec_v, sim_v):
        # Reduce over the row (sublane) axis only: cross-vreg VPU adds into a
        # lane-dense accumulator; no per-row cross-lane reduce for rec.
        rec_acc[...] += jnp.sum(rec_v, axis=0, keepdims=True)
        sim_acc[...] += jnp.sum(sim_v, axis=0, keepdims=True)

    if need_mask:  # static: only emitted when row tiles can run past N
        row0 = (pl.program_id(0) * num_inner + i) * tn

        @pl.when(row0 + tn <= n_rows)
        def _():
            _accum(rec_vals, sim_rows)

        @pl.when(row0 + tn > n_rows)
        def _():
            rows = row0 + lax.broadcasted_iota(jnp.int32, (tn, 1), 0)
            valid = rows < n_rows
            # Select (not multiply): NaN-safe against garbage in the
            # out-of-bounds tail of a partial / duplicated boundary tile.
            _accum(jnp.where(valid, rec_vals, jnp.float32(0.0)),
                   jnp.where(valid, sim_rows, jnp.float32(0.0)))
    else:
        _accum(rec_vals, sim_rows)

    # Scalar reduce + lane-dense (8,128) store only once per outer slice.
    @pl.when(i == num_inner - 1)
    def _():
        rec_ref[...] = jnp.full((1, 8, 128), jnp.sum(rec_acc[...]), jnp.float32)
        sim_ref[...] = jnp.full((1, 8, 128), jnp.sum(sim_acc[...]), jnp.float32)


def _layer_loss_sums(x, w, b, y, *, tn=1024, use_l2=False, bf16_matmul=False):
    """Returns (rec_sum, sim_sum) scalars for one layer.

    x: (N, Ds), w: (Ds, Dt) [= PyTorch Linear weight.T], b: (Dt,), y: (N, Dt)
    """
    n, ds = x.shape
    ds_w, dt = w.shape
    assert ds_w == ds and y.shape == (n, dt) and b.shape == (dt,)

    if bf16_matmul and x.dtype == jnp.float32:
        # bf16 MXU feed for f32 callers; accumulation / elementwise stay f32.
        x = x.astype(jnp.bfloat16)
        w = w.astype(jnp.bfloat16)

    # Column padding only when the embedding dims are not already lane-dense
    # multiples of 128 (the common 768/1024 case does no padding and hence no
    # extra HBM copies).  Rows are NEVER padded: partial row tiles are masked
    # in-kernel.  Zero column padding is loss-preserving (padded P and Y
    # columns are both 0).
    ds_p = ds if ds % 128 == 0 else _round_up(ds, 128)
    dt_p = dt if dt % 128 == 0 else _round_up(dt, 128)
    if ds_p != ds:
        x = jnp.pad(x, ((0, 0), (0, ds_p - ds)))
        w = jnp.pad(w, ((0, ds_p - ds), (0, 0)))
    if dt_p != dt:
        w = jnp.pad(w, ((0, 0), (0, dt_p - dt)))
        b = jnp.pad(b, (0, dt_p - dt))
        y = jnp.pad(y, ((0, 0), (0, dt_p - dt)))
    b2 = b.astype(jnp.float32).reshape(1, dt_p)   # cast once in the wrapper

    # Generation-aware VMEM budget (v7x has 64 MiB/core; v5e/v6e have 128 MiB).
    try:
        vmem_cap = int(pltpu.get_tpu_info().vmem_capacity_bytes)
    except Exception:
        vmem_cap = 64 * 2 ** 20          # conservative: v7x per-core VMEM
    budget = (vmem_cap * 3) // 4         # ~48 MiB on v7x, ~96 MiB on v5e/v6e

    x_item = x.dtype.itemsize
    w_item = w.dtype.itemsize
    y_item = y.dtype.itemsize

    # Resident weight/bias are single-buffered (constant index_map).
    w_bytes = _round_up(ds_p, 8) * dt_p * w_item
    b_bytes = 8 * dt_p * 4
    out_bytes = 4 * 8 * 128 * 4
    scr_bytes = 8 * dt_p * 4
    fixed = w_bytes + b_bytes + out_bytes + scr_bytes

    def _tile_bytes(t):
        x_t = t * ds_p * x_item
        y_t = t * dt_p * y_item
        interm = 4 * t * dt_p * 4      # f32 P + ~3 fused elementwise temps
        return 2 * (x_t + y_t) + interm

    # Row tile: big enough to amortize the ~0.35 us/step grid overhead, small
    # enough to fit the VMEM budget.
    tn = min(tn, _round_up(n, 8))
    tn = max(8, (tn // 8) * 8)
    while tn > 8 and fixed + _tile_bytes(tn) > budget:
        tn = max(8, (tn // 2 // 8) * 8)
    # TODO(synk): if W alone exceeds the VMEM budget (huge Ds*Dt, e.g.
    # 4096x4096 f32 on v7x), add a Dt-tiling grid axis with partial dot/norm
    # accumulation instead of keeping W fully resident.

    nblocks = -(-n // tn)
    # Always 2-way "parallel" outer axis when possible -> both TensorCores on
    # v7x megacore.  Odd block counts get a clamped duplicate block whose rows
    # are fully masked out in-kernel.
    outer = 2 if nblocks >= 2 else 1
    num_inner = -(-nblocks // outer)
    total_blocks = outer * num_inner
    need_mask = total_blocks * tn != n
    clamp = total_blocks > nblocks
    last_blk = nblocks - 1

    def row_map(g, i):
        lin = g * num_inner + i
        if clamp:
            lin = jnp.minimum(lin, last_blk)
        return (lin, 0)

    est = fixed + _tile_bytes(tn)
    vmem_limit = int(min(vmem_cap - 6 * 2 ** 20,
                         max(32 * 2 ** 20, int(1.5 * est))))
    vmem_limit = max(vmem_limit, 32 * 2 ** 20)

    kernel = functools.partial(_layer_loss_kernel, tn=tn, num_inner=num_inner,
                               n_rows=n, need_mask=need_mask, use_l2=use_l2)

    rec_scratch_shape = (1, 1) if use_l2 else (1, dt_p)

    def _build(single_buffer_w):
        w_kwargs = {"pipeline_mode": pl.Buffered(1)} if single_buffer_w else {}
        return pl.pallas_call(
            kernel,
            out_shape=(jax.ShapeDtypeStruct((outer, 8, 128), jnp.float32),
                       jax.ShapeDtypeStruct((outer, 8, 128), jnp.float32)),
            grid_spec=pltpu.PrefetchScalarGridSpec(
                num_scalar_prefetch=0,
                grid=(outer, num_inner),
                in_specs=[
                    pl.BlockSpec((tn, ds_p), row_map),
                    pl.BlockSpec((ds_p, dt_p), lambda g, i: (0, 0), **w_kwargs),
                    pl.BlockSpec((1, dt_p), lambda g, i: (0, 0), **w_kwargs),
                    pl.BlockSpec((tn, dt_p), row_map),
                ],
                out_specs=[
                    pl.BlockSpec((1, 8, 128), lambda g, i: (g, 0, 0)),
                    pl.BlockSpec((1, 8, 128), lambda g, i: (g, 0, 0)),
                ],
                scratch_shapes=[pltpu.VMEM(rec_scratch_shape, jnp.float32),
                                pltpu.VMEM((1, 1), jnp.float32)],
            ),
            compiler_params=pltpu.CompilerParams(
                dimension_semantics=("parallel", "arbitrary"),
                vmem_limit_bytes=vmem_limit),
        )

    try:
        rec, sim = _build(True)(x, w, b2, y)
    except Exception:
        # Fallback if single-buffering (pl.Buffered(1)) is rejected by this
        # JAX/Mosaic version: default double-buffered resident weight.
        rec, sim = _build(False)(x, w, b2, y)
    return jnp.sum(rec[:, 0, 0]), jnp.sum(sim[:, 0, 0])


def layerwise_embedding_loss(pred_list, target_list, weights, biases,
                             cos_weight=1.0, loss_type="l1",
                             last_layer_only=True, tn=1024,
                             bf16_matmul=False):
    """JAX/Pallas equivalent of Layerwise_embedding_loss.forward.

    The PyTorch source overwrites total_loss each iteration ('=' not '+='), so
    the return value depends only on the last layer; with last_layer_only=True
    (default) the dead per-layer work is skipped while returning the same value.
    """
    assert loss_type in ("l1", "l2"), loss_type
    use_l2 = loss_type == "l2"
    n_layers = len(pred_list)
    layer_ids = [n_layers - 1] if last_layer_only else list(range(n_layers))

    total_loss = jnp.float32(0.0)
    for idx in layer_ids:
        x = pred_list[idx]
        y = target_list[idx]
        n = x.shape[0] * x.shape[1]
        ds = x.shape[-1]
        dt = y.shape[-1]
        rec_sum, sim_sum = _layer_loss_sums(
            x.reshape(n, ds), weights[idx], biases[idx], y.reshape(n, dt),
            tn=tn, use_l2=use_l2, bf16_matmul=bf16_matmul)
        rec_loss = rec_sum / jnp.float32(n * dt)
        sim_loss = sim_sum / jnp.float32(n)
        total_loss = rec_loss + cos_weight * sim_loss   # overwrite, as in PyTorch
    return total_loss


def _reference_loss(pred_list, target_list, weights, biases,
                    cos_weight=1.0, loss_type="l1"):
    total = jnp.float32(0.0)
    for idx in range(len(pred_list)):
        p = pred_list[idx] @ weights[idx] + biases[idx]
        y = target_list[idx]
        d = p - y
        rec = jnp.mean(d * d) if loss_type == "l2" else jnp.mean(jnp.abs(d))
        eps = 1e-8
        dot = jnp.sum(p * y, axis=-1)
        n_p = jnp.maximum(jnp.linalg.norm(p, axis=-1), eps)
        n_y = jnp.maximum(jnp.linalg.norm(y, axis=-1), eps)
        cos = dot / (n_p * n_y)
        sim = jnp.mean(jnp.logaddexp(0.0, -cos))
        total = rec + cos_weight * sim
    return total


def _make_inputs(key, B, T, student_dim, teacher_dim):
    keys = jax.random.split(key, 4 * len(student_dim))
    pred_list, target_list, weights, biases = [], [], [], []
    k_i = 0
    for idx in range(len(student_dim)):
        ds, dt = student_dim[idx], teacher_dim[idx]
        pred_list.append(jax.random.normal(keys[k_i], (B, T, ds), jnp.float32)); k_i += 1
        target_list.append(jax.random.normal(keys[k_i], (B, T, dt), jnp.float32)); k_i += 1
        bound = 1.0 / float(jnp.sqrt(jnp.float32(ds)))
        w = jax.random.uniform(keys[k_i], (ds, dt), jnp.float32, -bound, bound); k_i += 1
        b = jax.random.uniform(keys[k_i], (dt,), jnp.float32, -bound, bound); k_i += 1
        weights.append(w)
        biases.append(b)
    return pred_list, target_list, weights, biases


if __name__ == "__main__":
    key = jax.random.PRNGKey(0)
    k1, k2 = jax.random.split(key)

    # --- Test A: small unaligned dims (column-padding path), l1 loss --------
    B, T = 2, 16
    pred_list, target_list, weights, biases = _make_inputs(
        k1, B, T, student_dim=[24, 24], teacher_dim=[32, 32])

    loss = layerwise_embedding_loss(pred_list, target_list, weights, biases)
    loss = jax.block_until_ready(loss)
    loss_all = layerwise_embedding_loss(pred_list, target_list, weights, biases,
                                        last_layer_only=False)
    loss_all = jax.block_until_ready(loss_all)
    ref = _reference_loss(pred_list, target_list, weights, biases)
    assert jnp.allclose(loss, ref, atol=1e-3, rtol=1e-3), (loss, ref)
    assert jnp.allclose(loss_all, ref, atol=1e-3, rtol=1e-3), (loss_all, ref)

    # bf16 MXU-feed path on the same data (looser tolerance, by design).
    loss_bf16 = layerwise_embedding_loss(pred_list, target_list, weights,
                                         biases, bf16_matmul=True)
    loss_bf16 = jax.block_until_ready(loss_bf16)
    assert jnp.allclose(loss_bf16, ref, atol=3e-2, rtol=3e-2), (loss_bf16, ref)

    # --- Test B: lane-aligned dims (no padding), partial last row tile, odd
    # block count (exercises the clamped duplicate block + masking), l2 loss --
    B2, T2 = 2, 23                       # N = 46 rows; tn=16 -> 3 blocks
    pred2, target2, w2, b2 = _make_inputs(
        k2, B2, T2, student_dim=[128], teacher_dim=[256])
    loss2 = layerwise_embedding_loss(pred2, target2, w2, b2,
                                     loss_type="l2", tn=16)
    loss2 = jax.block_until_ready(loss2)
    ref2 = _reference_loss(pred2, target2, w2, b2, loss_type="l2")
    assert jnp.allclose(loss2, ref2, atol=1e-3, rtol=1e-3), (loss2, ref2)

    print("KERNEL_OK")
</pallas_src>

<mosaic_0001>
module attributes {stable_mosaic.version = 11 : i64} {
  func.func @_layer_loss_kernel(%arg0: i32, %arg1: i32, %arg2: memref<32x128xf32, #tpu.memory_space<vmem>>, %arg3: memref<128x128xf32, #tpu.memory_space<vmem>>, %arg4: memref<1x128xf32, #tpu.memory_space<vmem>>, %arg5: memref<32x128xf32, #tpu.memory_space<vmem>>, %arg6: memref<1x8x128xf32, #tpu.memory_space<vmem>>, %arg7: memref<1x8x128xf32, #tpu.memory_space<vmem>>, %arg8: memref<1x128xf32, #tpu.memory_space<vmem>>, %arg9: memref<1x1xf32, #tpu.memory_space<vmem>>) attributes {dimension_semantics = [#tpu.dimension_semantics<parallel>, #tpu.dimension_semantics<arbitrary>], iteration_bounds = array<i64: 1, 1>, scalar_prefetch = 0 : i64, scratch_operands = 2 : i64, tpu.core_type = #tpu.core_type<tc>, window_params = [{transform_indices = @transform_0, window_bounds = array<i64: 32, 128>}, {pipeline_mode = #tpu.pipeline_mode<synchronous>, transform_indices = @transform_1, window_bounds = array<i64: 128, 128>}, {pipeline_mode = #tpu.pipeline_mode<synchronous>, transform_indices = @transform_2, window_bounds = array<i64: 1, 128>}, {transform_indices = @transform_3, window_bounds = array<i64: 32, 128>}, {transform_indices = @transform_4, window_bounds = array<i64: 1, 8, 128>}, {transform_indices = @transform_5, window_bounds = array<i64: 1, 8, 128>}]} {
    %c0_i32 = arith.constant 0 : i32
    %0 = arith.cmpi eq, %arg1, %c0_i32 : i32
    %1 = arith.extui %0 : i1 to i32
    %c0_i32_0 = arith.constant 0 : i32
    %2 = arith.cmpi ne, %1, %c0_i32_0 : i32
    scf.if %2 {
      %cst_28 = arith.constant 0.000000e+00 : f32
      %58 = vector.broadcast %cst_28 : f32 to vector<1x128xf32>
      %c0_29 = arith.constant 0 : index
      %c0_30 = arith.constant 0 : index
      %59 = vector.load %arg8[%c0_29, %c0_30] : memref<1x128xf32, #tpu.memory_space<vmem>>, vector<1x128xf32>
      tpu.vector_store %arg8[%c0_29, %c0_30], %58 {strides = array<i32>} : memref<1x128xf32, #tpu.memory_space<vmem>>, vector<1x128xf32>,
      %cst_31 = arith.constant 0.000000e+00 : f32
      %60 = vector.broadcast %cst_31 : f32 to vector<1x1xf32>
      %c0_32 = arith.constant 0 : index
      %c0_33 = arith.constant 0 : index
      %61 = vector.load %arg9[%c0_32, %c0_33] : memref<1x1xf32, #tpu.memory_space<vmem>>, vector<1x1xf32>
      tpu.vector_store %arg9[%c0_32, %c0_33], %60 {strides = array<i32>} : memref<1x1xf32, #tpu.memory_space<vmem>>, vector<1x1xf32>,
    } else {
    }
    %c0 = arith.constant 0 : index
    %c0_1 = arith.constant 0 : index
    %3 = vector.load %arg2[%c0, %c0_1] : memref<32x128xf32, #tpu.memory_space<vmem>>, vector<32x128xf32>
    %c0_2 = arith.constant 0 : index
    %c0_3 = arith.constant 0 : index
    %4 = vector.load %arg3[%c0_2, %c0_3] : memref<128x128xf32, #tpu.memory_space<vmem>>, vector<128x128xf32>
    %c0_4 = arith.constant 0 : index
    %c0_5 = arith.constant 0 : index
    %5 = vector.load %arg4[%c0_4, %c0_5] : memref<1x128xf32, #tpu.memory_space<vmem>>, vector<1x128xf32>
    %c0_6 = arith.constant 0 : index
    %c0_7 = arith.constant 0 : index
    %6 = vector.load %arg5[%c0_6, %c0_7] : memref<32x128xf32, #tpu.memory_space<vmem>>, vector<32x128xf32>
    %cst = arith.constant dense<0.000000e+00> : vector<32x128xf32>
    %7 = tpu.matmul %3, %4, %cst {dimension_numbers = #tpu.dot_dimension_numbers<[1], [0], [0], [1], [0, 0, 1, 1], [], []>} : vector<32x128xf32>, vector<128x128xf32>, vector<32x128xf32> -> vector<32x128xf32>
    %8 = vector.broadcast %5 : vector<1x128xf32> to vector<32x128xf32>
    %9 = arith.addf %7, %8 : vector<32x128xf32>
    %10 = arith.mulf %9, %6 : vector<32x128xf32>
    %cst_8 = arith.constant dense<0.000000e+00> : vector<32xf32>
    %11 = vector.multi_reduction <add>, %10, %cst_8 [1] : vector<32x128xf32> to vector<32xf32>
    %12 = vector.shape_cast %11 : vector<32xf32> to vector<32x1xf32>
    %13 = arith.mulf %9, %9 : vector<32x128xf32>
    %cst_9 = arith.constant dense<0.000000e+00> : vector<32xf32>
    %14 = vector.multi_reduction <add>, %13, %cst_9 [1] : vector<32x128xf32> to vector<32xf32>
    %15 = vector.shape_cast %14 : vector<32xf32> to vector<32x1xf32>
    %16 = arith.mulf %6, %6 : vector<32x128xf32>
    %cst_10 = arith.constant dense<0.000000e+00> : vector<32xf32>
    %17 = vector.multi_reduction <add>, %16, %cst_10 [1] : vector<32x128xf32> to vector<32xf32>
    %18 = vector.shape_cast %17 : vector<32xf32> to vector<32x1xf32>
    %cst_11 = arith.constant 1.000000e-16 : f32
    %19 = vector.broadcast %cst_11 : f32 to vector<32x1xf32>
    %20 = arith.maximumf %15, %19 : vector<32x1xf32>
    %21 = math.rsqrt %20 : vector<32x1xf32>
    %22 = arith.mulf %12, %21 : vector<32x1xf32>
    %cst_12 = arith.constant 1.000000e-16 : f32
    %23 = vector.broadcast %cst_12 : f32 to vector<32x1xf32>
    %24 = arith.maximumf %18, %23 : vector<32x1xf32>
    %25 = math.rsqrt %24 : vector<32x1xf32>
    %26 = arith.mulf %22, %25 : vector<32x1xf32>
    %cst_13 = arith.constant 0.000000e+00 : f32
    %27 = vector.broadcast %cst_13 : f32 to vector<32x1xf32>
    %28 = arith.subf %27, %26 : vector<32x1xf32>
    %cst_14 = arith.constant 0.000000e+00 : f32
    %29 = vector.broadcast %cst_14 : f32 to vector<32x1xf32>
    %30 = arith.maximumf %29, %28 : vector<32x1xf32>
    %31 = vector.broadcast %cst_14 : f32 to vector<32x1xf32>
    %32 = arith.subf %31, %28 : vector<32x1xf32>
    %33 = arith.cmpf one, %32, %32 : vector<32x1xf32>
    %34 = vector.broadcast %cst_14 : f32 to vector<32x1xf32>
    %35 = arith.addf %34, %28 : vector<32x1xf32>
    %36 = math.absf %32 : vector<32x1xf32>
    %cst_15 = arith.constant 0.000000e+00 : f32
    %37 = vector.broadcast %cst_15 : f32 to vector<32x1xf32>
    %38 = arith.subf %37, %36 : vector<32x1xf32>
    %39 = math.exp %38 : vector<32x1xf32>
    %40 = math.log1p %39 : vector<32x1xf32>
    %41 = arith.addf %30, %40 : vector<32x1xf32>
    %42 = arith.select %33, %35, %41 : vector<32x1xi1>, vector<32x1xf32>
    %43 = arith.subf %9, %6 : vector<32x128xf32>
    %44 = math.absf %43 : vector<32x128xf32>
    %c0_16 = arith.constant 0 : index
    %c0_17 = arith.constant 0 : index
    %45 = vector.load %arg8[%c0_16, %c0_17] : memref<1x128xf32, #tpu.memory_space<vmem>>, vector<1x128xf32>
    %cst_18 = arith.constant dense<0.000000e+00> : vector<128xf32>
    %46 = vector.multi_reduction <add>, %44, %cst_18 [0] : vector<32x128xf32> to vector<128xf32>
    %47 = vector.shape_cast %46 : vector<128xf32> to vector<1x128xf32>
    %48 = arith.addf %45, %47 : vector<1x128xf32>
    %c0_19 = arith.constant 0 : index
    %c0_20 = arith.constant 0 : index
    %49 = vector.load %arg8[%c0_19, %c0_20] : memref<1x128xf32, #tpu.memory_space<vmem>>, vector<1x128xf32>
    tpu.vector_store %arg8[%c0_19, %c0_20], %48 {strides = array<i32>} : memref<1x128xf32, #tpu.memory_space<vmem>>, vector<1x128xf32>,
    %c0_21 = arith.constant 0 : index
    %c0_22 = arith.constant 0 : index
    %50 = vector.load %arg9[%c0_21, %c0_22] : memref<1x1xf32, #tpu.memory_space<vmem>>, vector<1x1xf32>
    %cst_23 = arith.constant dense<0.000000e+00> : vector<1xf32>
    %51 = vector.multi_reduction <add>, %42, %cst_23 [0] : vector<32x1xf32> to vector<1xf32>
    %52 = vector.shape_cast %51 : vector<1xf32> to vector<1x1xf32>
    %53 = arith.addf %50, %52 : vector<1x1xf32>
    %c0_24 = arith.constant 0 : index
    %c0_25 = arith.constant 0 : index
    %54 = vector.load %arg9[%c0_24, %c0_25] : memref<1x1xf32, #tpu.memory_space<vmem>>, vector<1x1xf32>
    tpu.vector_store %arg9[%c0_24, %c0_25], %53 {strides = array<i32>} : memref<1x1xf32, #tpu.memory_space<vmem>>, vector<1x1xf32>,
    %c0_i32_26 = arith.constant 0 : i32
    %55 = arith.cmpi eq, %arg1, %c0_i32_26 : i32
    %56 = arith.extui %55 : i1 to i32
    %c0_i32_27 = arith.constant 0 : i32
    %57 = arith.cmpi ne, %56, %c0_i32_27 : i32
    scf.if %57 {
      %c0_28 = arith.constant 0 : index
      %c0_29 = arith.constant 0 : index
      %58 = vector.load %arg8[%c0_28, %c0_29] : memref<1x128xf32, #tpu.memory_space<vmem>>, vector<1x128xf32>
      %59 = vector.shape_cast %58 : vector<1x128xf32> to vector<1x1x128xf32>
      %cst_30 = arith.constant dense<0.000000e+00> : vector<1xf32>
      %60 = vector.multi_reduction <add>, %59, %cst_30 [1, 2] : vector<1x1x128xf32> to vector<1xf32>
      %61 = vector.shape_cast %60 : vector<1xf32> to vector<1x1x1xf32>
      %62 = vector.extract %61[0, 0, 0] : f32 from vector<1x1x1xf32>
      %63 = vector.broadcast %62 : f32 to vector<1x8x128xf32>
      %c0_31 = arith.constant 0 : index
      %c0_32 = arith.constant 0 : index
      %c0_33 = arith.constant 0 : index
      %64 = vector.load %arg6[%c0_31, %c0_32, %c0_33] : memref<1x8x128xf32, #tpu.memory_space<vmem>>, vector<1x8x128xf32>
      tpu.vector_store %arg6[%c0_31, %c0_32, %c0_33], %63 {strides = array<i32>} : memref<1x8x128xf32, #tpu.memory_space<vmem>>, vector<1x8x128xf32>,
      %c0_34 = arith.constant 0 : index
      %c0_35 = arith.constant 0 : index
      %65 = vector.load %arg9[%c0_34, %c0_35] : memref<1x1xf32, #tpu.memory_space<vmem>>, vector<1x1xf32>
      %66 = vector.shape_cast %65 : vector<1x1xf32> to vector<1x1x1xf32>
      %cst_36 = arith.constant dense<0.000000e+00> : vector<1xf32>
      %67 = vector.multi_reduction <add>, %66, %cst_36 [1, 2] : vector<1x1x1xf32> to vector<1xf32>
      %68 = vector.shape_cast %67 : vector<1xf32> to vector<1x1x1xf32>
      %69 = vector.extract %68[0, 0, 0] : f32 from vector<1x1x1xf32>
      %70 = vector.broadcast %69 : f32 to vector<1x8x128xf32>
      %c0_37 = arith.constant 0 : index
      %c0_38 = arith.constant 0 : index
      %c0_39 = arith.constant 0 : index
      %71 = vector.load %arg7[%c0_37, %c0_38, %c0_39] : memref<1x8x128xf32, #tpu.memory_space<vmem>>, vector<1x8x128xf32>
      tpu.vector_store %arg7[%c0_37, %c0_38, %c0_39], %70 {strides = array<i32>} : memref<1x8x128xf32, #tpu.memory_space<vmem>>, vector<1x8x128xf32>,
    } else {
    }
    return
  }
  func.func @transform_0(%arg0: i32, %arg1: i32) -> (i32, i32) {
    %c1_i32 = arith.constant 1 : i32
    %0 = arith.muli %arg0, %c1_i32 : i32
    %1 = arith.addi %0, %arg1 : i32
    %c0_i32 = arith.constant 0 : i32
    %c0_i32_0 = arith.constant 0 : i32
    return %1, %c0_i32 : i32, i32
  }
  func.func @transform_1(%arg0: i32, %arg1: i32) -> (i32, i32) {
    %c0_i32 = arith.constant 0 : i32
    %c0_i32_0 = arith.constant 0 : i32
    %c0_i32_1 = arith.constant 0 : i32
    return %c0_i32, %c0_i32_0 : i32, i32
  }
  func.func @transform_2(%arg0: i32, %arg1: i32) -> (i32, i32) {
    %c0_i32 = arith.constant 0 : i32
    %c0_i32_0 = arith.constant 0 : i32
    %c0_i32_1 = arith.constant 0 : i32
    return %c0_i32, %c0_i32_0 : i32, i32
  }
  func.func @transform_3(%arg0: i32, %arg1: i32) -> (i32, i32) {
    %c1_i32 = arith.constant 1 : i32
    %0 = arith.muli %arg0, %c1_i32 : i32
    %1 = arith.addi %0, %arg1 : i32
    %c0_i32 = arith.constant 0 : i32
    %c0_i32_0 = arith.constant 0 : i32
    return %1, %c0_i32 : i32, i32
  }
  func.func @transform_4(%arg0: i32, %arg1: i32) -> (i32, i32, i32) {
    %c0_i32 = arith.constant 0 : i32
    %c0_i32_0 = arith.constant 0 : i32
    %c0_i32_1 = arith.constant 0 : i32
    return %arg0, %c0_i32, %c0_i32_0 : i32, i32, i32
  }
  func.func @transform_5(%arg0: i32, %arg1: i32) -> (i32, i32, i32) {
    %c0_i32 = arith.constant 0 : i32
    %c0_i32_0 = arith.constant 0 : i32
    %c0_i32_1 = arith.constant 0 : i32
    return %arg0, %c0_i32, %c0_i32_0 : i32, i32, i32
  }
}

module attributes {stable_mosaic.version = 11 : i64} {
  func.func @_layer_loss_kernel(%arg0: i32, %arg1: i32, %arg2: memref<32x128xf32, #tpu.memory_space<vmem>>, %arg3: memref<128x128xf32, #tpu.memory_space<vmem>>, %arg4: memref<1x128xf32, #tpu.memory_space<vmem>>, %arg5: memref<32x128xf32, #tpu.memory_space<vmem>>, %arg6: memref<1x8x128xf32, #tpu.memory_space<vmem>>, %arg7: memref<1x8x128xf32, #tpu.memory_space<vmem>>, %arg8: memref<1x128xf32, #tpu.memory_space<vmem>>, %arg9: memref<1x1xf32, #tpu.memory_space<vmem>>) attributes {dimension_semantics = [#tpu.dimension_semantics<parallel>, #tpu.dimension_semantics<arbitrary>], iteration_bounds = array<i64: 1, 1>, scalar_prefetch = 0 : i64, scratch_operands = 2 : i64, tpu.core_type = #tpu.core_type<tc>, window_params = [{transform_indices = @transform_0, window_bounds = array<i64: 32, 128>}, {pipeline_mode = #tpu.pipeline_mode<synchronous>, transform_indices = @transform_1, window_bounds = array<i64: 128, 128>}, {pipeline_mode = #tpu.pipeline_mode<synchronous>, transform_indices = @transform_2, window_bounds = array<i64: 1, 128>}, {transform_indices = @transform_3, window_bounds = array<i64: 32, 128>}, {transform_indices = @transform_4, window_bounds = array<i64: 1, 8, 128>}, {transform_indices = @transform_5, window_bounds = array<i64: 1, 8, 128>}]} {
    %c0_i32 = arith.constant 0 : i32
    %0 = arith.cmpi eq, %arg1, %c0_i32 : i32
    %1 = arith.extui %0 : i1 to i32
    %c0_i32_0 = arith.constant 0 : i32
    %2 = arith.cmpi ne, %1, %c0_i32_0 : i32
    scf.if %2 {
      %cst_28 = arith.constant 0.000000e+00 : f32
      %58 = vector.broadcast %cst_28 : f32 to vector<1x128xf32>
      %c0_29 = arith.constant 0 : index
      %c0_30 = arith.constant 0 : index
      %59 = vector.load %arg8[%c0_29, %c0_30] : memref<1x128xf32, #tpu.memory_space<vmem>>, vector<1x128xf32>
      tpu.vector_store %arg8[%c0_29, %c0_30], %58 {strides = array<i32>} : memref<1x128xf32, #tpu.memory_space<vmem>>, vector<1x128xf32>,
      %cst_31 = arith.constant 0.000000e+00 : f32
      %60 = vector.broadcast %cst_31 : f32 to vector<1x1xf32>
      %c0_32 = arith.constant 0 : index
      %c0_33 = arith.constant 0 : index
      %61 = vector.load %arg9[%c0_32, %c0_33] : memref<1x1xf32, #tpu.memory_space<vmem>>, vector<1x1xf32>
      tpu.vector_store %arg9[%c0_32, %c0_33], %60 {strides = array<i32>} : memref<1x1xf32, #tpu.memory_space<vmem>>, vector<1x1xf32>,
    } else {
    }
    %c0 = arith.constant 0 : index
    %c0_1 = arith.constant 0 : index
    %3 = vector.load %arg2[%c0, %c0_1] : memref<32x128xf32, #tpu.memory_space<vmem>>, vector<32x128xf32>
    %c0_2 = arith.constant 0 : index
    %c0_3 = arith.constant 0 : index
    %4 = vector.load %arg3[%c0_2, %c0_3] : memref<128x128xf32, #tpu.memory_space<vmem>>, vector<128x128xf32>
    %c0_4 = arith.constant 0 : index
    %c0_5 = arith.constant 0 : index
    %5 = vector.load %arg4[%c0_4, %c0_5] : memref<1x128xf32, #tpu.memory_space<vmem>>, vector<1x128xf32>
    %c0_6 = arith.constant 0 : index
    %c0_7 = arith.constant 0 : index
    %6 = vector.load %arg5[%c0_6, %c0_7] : memref<32x128xf32, #tpu.memory_space<vmem>>, vector<32x128xf32>
    %cst = arith.constant dense<0.000000e+00> : vector<32x128xf32>
    %7 = tpu.matmul %3, %4, %cst {dimension_numbers = #tpu.dot_dimension_numbers<[1], [0], [0], [1], [0, 0, 1, 1], [], []>} : vector<32x128xf32>, vector<128x128xf32>, vector<32x128xf32> -> vector<32x128xf32>
    %8 = vector.broadcast %5 : vector<1x128xf32> to vector<32x128xf32>
    %9 = arith.addf %7, %8 : vector<32x128xf32>
    %10 = arith.mulf %9, %6 : vector<32x128xf32>
    %cst_8 = arith.constant dense<0.000000e+00> : vector<32xf32>
    %11 = vector.multi_reduction <add>, %10, %cst_8 [1] : vector<32x128xf32> to vector<32xf32>
    %12 = vector.shape_cast %11 : vector<32xf32> to vector<32x1xf32>
    %13 = arith.mulf %9, %9 : vector<32x128xf32>
    %cst_9 = arith.constant dense<0.000000e+00> : vector<32xf32>
    %14 = vector.multi_reduction <add>, %13, %cst_9 [1] : vector<32x128xf32> to vector<32xf32>
    %15 = vector.shape_cast %14 : vector<32xf32> to vector<32x1xf32>
    %16 = arith.mulf %6, %6 : vector<32x128xf32>
    %cst_10 = arith.constant dense<0.000000e+00> : vector<32xf32>
    %17 = vector.multi_reduction <add>, %16, %cst_10 [1] : vector<32x128xf32> to vector<32xf32>
    %18 = vector.shape_cast %17 : vector<32xf32> to vector<32x1xf32>
    %cst_11 = arith.constant 1.000000e-16 : f32
    %19 = vector.broadcast %cst_11 : f32 to vector<32x1xf32>
    %20 = arith.maximumf %15, %19 : vector<32x1xf32>
    %21 = math.rsqrt %20 : vector<32x1xf32>
    %22 = arith.mulf %12, %21 : vector<32x1xf32>
    %cst_12 = arith.constant 1.000000e-16 : f32
    %23 = vector.broadcast %cst_12 : f32 to vector<32x1xf32>
    %24 = arith.maximumf %18, %23 : vector<32x1xf32>
    %25 = math.rsqrt %24 : vector<32x1xf32>
    %26 = arith.mulf %22, %25 : vector<32x1xf32>
    %cst_13 = arith.constant 0.000000e+00 : f32
    %27 = vector.broadcast %cst_13 : f32 to vector<32x1xf32>
    %28 = arith.subf %27, %26 : vector<32x1xf32>
    %cst_14 = arith.constant 0.000000e+00 : f32
    %29 = vector.broadcast %cst_14 : f32 to vector<32x1xf32>
    %30 = arith.maximumf %29, %28 : vector<32x1xf32>
    %31 = vector.broadcast %cst_14 : f32 to vector<32x1xf32>
    %32 = arith.subf %31, %28 : vector<32x1xf32>
    %33 = arith.cmpf one, %32, %32 : vector<32x1xf32>
    %34 = vector.broadcast %cst_14 : f32 to vector<32x1xf32>
    %35 = arith.addf %34, %28 : vector<32x1xf32>
    %36 = math.absf %32 : vector<32x1xf32>
    %cst_15 = arith.constant 0.000000e+00 : f32
    %37 = vector.broadcast %cst_15 : f32 to vector<32x1xf32>
    %38 = arith.subf %37, %36 : vector<32x1xf32>
    %39 = math.exp %38 : vector<32x1xf32>
    %40 = math.log1p %39 : vector<32x1xf32>
    %41 = arith.addf %30, %40 : vector<32x1xf32>
    %42 = arith.select %33, %35, %41 : vector<32x1xi1>, vector<32x1xf32>
    %43 = arith.subf %9, %6 : vector<32x128xf32>
    %44 = math.absf %43 : vector<32x128xf32>
    %c0_16 = arith.constant 0 : index
    %c0_17 = arith.constant 0 : index
    %45 = vector.load %arg8[%c0_16, %c0_17] : memref<1x128xf32, #tpu.memory_space<vmem>>, vector<1x128xf32>
    %cst_18 = arith.constant dense<0.000000e+00> : vector<128xf32>
    %46 = vector.multi_reduction <add>, %44, %cst_18 [0] : vector<32x128xf32> to vector<128xf32>
    %47 = vector.shape_cast %46 : vector<128xf32> to vector<1x128xf32>
    %48 = arith.addf %45, %47 : vector<1x128xf32>
    %c0_19 = arith.constant 0 : index
    %c0_20 = arith.constant 0 : index
    %49 = vector.load %arg8[%c0_19, %c0_20] : memref<1x128xf32, #tpu.memory_space<vmem>>, vector<1x128xf32>
    tpu.vector_store %arg8[%c0_19, %c0_20], %48 {strides = array<i32>} : memref<1x128xf32, #tpu.memory_space<vmem>>, vector<1x128xf32>,
    %c0_21 = arith.constant 0 : index
    %c0_22 = arith.constant 0 : index
    %50 = vector.load %arg9[%c0_21, %c0_22] : memref<1x1xf32, #tpu.memory_space<vmem>>, vector<1x1xf32>
    %cst_23 = arith.constant dense<0.000000e+00> : vector<1xf32>
    %51 = vector.multi_reduction <add>, %42, %cst_23 [0] : vector<32x1xf32> to vector<1xf32>
    %52 = vector.shape_cast %51 : vector<1xf32> to vector<1x1xf32>
    %53 = arith.addf %50, %52 : vector<1x1xf32>
    %c0_24 = arith.constant 0 : index
    %c0_25 = arith.constant 0 : index
    %54 = vector.load %arg9[%c0_24, %c0_25] : memref<1x1xf32, #tpu.memory_space<vmem>>, vector<1x1xf32>
    tpu.vector_store %arg9[%c0_24, %c0_25], %53 {strides = array<i32>} : memref<1x1xf32, #tpu.memory_space<vmem>>, vector<1x1xf32>,
    %c0_i32_26 = arith.constant 0 : i32
    %55 = arith.cmpi eq, %arg1, %c0_i32_26 : i32
    %56 = arith.extui %55 : i1 to i32
    %c0_i32_27 = arith.constant 0 : i32
    %57 = arith.cmpi ne, %56, %c0_i32_27 : i32
    scf.if %57 {
      %c0_28 = arith.constant 0 : index
      %c0_29 = arith.constant 0 : index
      %58 = vector.load %arg8[%c0_28, %c0_29] : memref<1x128xf32, #tpu.memory_space<vmem>>, vector<1x128xf32>
      %59 = vector.shape_cast %58 : vector<1x128xf32> to vector<1x1x128xf32>
      %cst_30 = arith.constant dense<0.000000e+00> : vector<1xf32>
      %60 = vector.multi_reduction <add>, %59, %cst_30 [1, 2] : vector<1x1x128xf32> to vector<1xf32>
      %61 = vector.shape_cast %60 : vector<1xf32> to vector<1x1x1xf32>
      %62 = vector.extract %61[0, 0, 0] : f32 from vector<1x1x1xf32>
      %63 = vector.broadcast %62 : f32 to vector<1x8x128xf32>
      %c0_31 = arith.constant 0 : index
      %c0_32 = arith.constant 0 : index
      %c0_33 = arith.constant 0 : index
      %64 = vector.load %arg6[%c0_31, %c0_32, %c0_33] : memref<1x8x128xf32, #tpu.memory_space<vmem>>, vector<1x8x128xf32>
      tpu.vector_store %arg6[%c0_31, %c0_32, %c0_33], %63 {strides = array<i32>} : memref<1x8x128xf32, #tpu.memory_space<vmem>>, vector<1x8x128xf32>,
      %c0_34 = arith.constant 0 : index
      %c0_35 = arith.constant 0 : index
      %65 = vector.load %arg9[%c0_34, %c0_35] : memref<1x1xf32, #tpu.memory_space<vmem>>, vector<1x1xf32>
      %66 = vector.shape_cast %65 : vector<1x1xf32> to vector<1x1x1xf32>
      %cst_36 = arith.constant dense<0.000000e+00> : vector<1xf32>
      %67 = vector.multi_reduction <add>, %66, %cst_36 [1, 2] : vector<1x1x1xf32> to vector<1xf32>
      %68 = vector.shape_cast %67 : vector<1xf32> to vector<1x1x1xf32>
      %69 = vector.extract %68[0, 0, 0] : f32 from vector<1x1x1xf32>
      %70 = vector.broadcast %69 : f32 to vector<1x8x128xf32>
      %c0_37 = arith.constant 0 : index
      %c0_38 = arith.constant 0 : index
      %c0_39 = arith.constant 0 : index
      %71 = vector.load %arg7[%c0_37, %c0_38, %c0_39] : memref<1x8x128xf32, #tpu.memory_space<vmem>>, vector<1x8x128xf32>
      tpu.vector_store %arg7[%c0_37, %c0_38, %c0_39], %70 {strides = array<i32>} : memref<1x8x128xf32, #tpu.memory_space<vmem>>, vector<1x8x128xf32>,
    } else {
    }
    return
  }
  func.func @transform_0(%arg0: i32, %arg1: i32) -> (i32, i32) {
    %c1_i32 = arith.constant 1 : i32
    %0 = arith.muli %arg0, %c1_i32 : i32
    %1 = arith.addi %0, %arg1 : i32
    %c0_i32 = arith.constant 0 : i32
    %c0_i32_0 = arith.constant 0 : i32
    return %1, %c0_i32 : i32, i32
  }
  func.func @transform_1(%arg0: i32, %arg1: i32) -> (i32, i32) {
    %c0_i32 = arith.constant 0 : i32
    %c0_i32_0 = arith.constant 0 : i32
    %c0_i32_1 = arith.constant 0 : i32
    return %c0_i32, %c0_i32_0 : i32, i32
  }
  func.func @transform_2(%arg0: i32, %arg1: i32) -> (i32, i32) {
    %c0_i32 = arith.constant 0 : i32
    %c0_i32_0 = arith.constant 0 : i32
    %c0_i32_1 = arith.constant 0 : i32
    return %c0_i32, %c0_i32_0 : i32, i32
  }
  func.func @transform_3(%arg0: i32, %arg1: i32) -> (i32, i32) {
    %c1_i32 = arith.constant 1 : i32
    %0 = arith.muli %arg0, %c1_i32 : i32
    %1 = arith.addi %0, %arg1 : i32
    %c0_i32 = arith.constant 0 : i32
    %c0_i32_0 = arith.constant 0 : i32
    return %1, %c0_i32 : i32, i32
  }
  func.func @transform_4(%arg0: i32, %arg1: i32) -> (i32, i32, i32) {
    %c0_i32 = arith.constant 0 : i32
    %c0_i32_0 = arith.constant 0 : i32
    %c0_i32_1 = arith.constant 0 : i32
    return %arg0, %c0_i32, %c0_i32_0 : i32, i32, i32
  }
  func.func @transform_5(%arg0: i32, %arg1: i32) -> (i32, i32, i32) {
    %c0_i32 = arith.constant 0 : i32
    %c0_i32_0 = arith.constant 0 : i32
    %c0_i32_1 = arith.constant 0 : i32
    return %arg0, %c0_i32, %c0_i32_0 : i32, i32, i32
  }
}

</mosaic_0001>

<bundles_post_ra>
// kernel: tpu_custom_call.1
= control target key start
LH: loop header
LB: loop body
LE: loop exit
PB: predicated region body
PF: predicated region fallthrough
CT: control target
= control target key end

     0   :  { %11 = vsyncpa [#allocation5], 0  ;;  %s850_s0 = inlined_call_operand.hbm [shape: f32[32,128], index: 0, kind: input, shape index: {}]   ;;  %s851_s1 = inlined_call_operand.hbm [shape: f32[128,128], index: 1, kind: input, shape index: {}]   ;;  %s852_s2 = inlined_call_operand.vmem [shape: f32[1,128], index: 2, kind: input, shape index: {}]   ;;  %s853_s3 = inlined_call_operand.hbm [shape: f32[32,128], index: 3, kind: input, shape index: {}]   ;;  %s854_s4 = inlined_call_operand.hbm [shape: f32[1,8,128], index: 4, kind: output, shape index: {0}]   ;;  %s855_s5 = inlined_call_operand.hbm [shape: f32[1,8,128], index: 5, kind: output, shape index: {1}]  }
   0x1   :  { %12 = vsyncpa [#allocation8], 0 }
   0x2   :  { %13 = vsyncpa [#allocation6], 0 }
   0x3   :  { %14 = vsyncpa [#allocation12], 0  ;;  %s691_s18 = smov [#allocation7]   ;;  %s692_s20 = smov [#allocation4]  }
   0x4   :  { %s36_s19 = sshll.u32 %s691_s18, 4  ;;  %s24_s21 = sshll.u32 %s692_s20, 4  ;;  %s37_s19 = int_to_ptr.vmem [resolvable:$true] %s36_s19  ;;  %s729_s21 = int_to_ptr.vmem [resolvable:$true] %s24_s21 }
   0x5   :  { %s573_s24 = scalar_lea.hbm %s851_s1, 2048 }
   0x6   :  { %p574_p0 = scmp.ne.s32.totalorder %s851_s1, %s573_s24  ;;  %p577_p1 = scmp.lt.u32.totalorder %s573_s24, %s851_s1 }
   0x8   :  { %p579_p2 = pnand %p577_p1, %p574_p0 }
   0xa   :  { %582 = shalt.err (!%p579_p2)
}
   0xb   :  { %s583_s29 = scalar_lea.vmem %s37_s19, 2048  ;;  %p588_p4 = scmp.lt.s32.totalorder %s37_s19, %s37_s19 }
   0xc   :  { %p584_p3 = scmp.ne.s32.totalorder %s37_s19, %s583_s29  ;;  %p589_p5 = scmp.lt.s32.totalorder %s583_s29, %s583_s29 }
   0xe   :  { %p590_p6 = por %p589_p5, %p588_p4 }
  0x10   :  { %p591_p7 = pnand %p590_p6, %p584_p3 }
  0x12   :  { %594 = shalt.err (!%p591_p7)
}
  0x13   :  { %s693_s30 = smov 128   ;;  %s694_s6 = smov 8  }
  0x14   :  { %42 = dma.hbm_to_vmem [thread:$0]  %s851_s1, 2048, %s37_s19, [#allocation8], %s693_s30, %s693_s30, %s694_s6  }
  0x15   :  { %s595_s11 = scalar_lea.hbm %s850_s0, 512 }
  0x16   :  { %p596_p8 = scmp.ne.s32.totalorder %s850_s0, %s595_s11  ;;  %p599_p9 = scmp.lt.u32.totalorder %s595_s11, %s850_s0 }
  0x18   :  { %p601_p10 = pnand %p599_p9, %p596_p8 }
  0x1a   :  { %604 = shalt.err (!%p601_p10)
}
  0x1b   :  { %s605_s16 = scalar_lea.vmem %s729_s21, 512  ;;  %p610_p12 = scmp.lt.s32.totalorder %s729_s21, %s729_s21 }
  0x1c   :  { %p606_p11 = scmp.ne.s32.totalorder %s729_s21, %s605_s16  ;;  %p611_p13 = scmp.lt.s32.totalorder %s605_s16, %s605_s16 }
  0x1e   :  { %p612_p0 = por %p611_p13, %p610_p12 }
  0x20   :  { %p613_p1 = pnand %p612_p0, %p606_p11 }
  0x22   :  { %616 = shalt.err (!%p613_p1)
}
  0x23   :  { %30 = dma.hbm_to_vmem [thread:$0]  %s850_s0, 512, %s729_s21, [#allocation5], %s693_s30, %s693_s30, %s694_s6  }
  0x24   :  { %s695_s18 = smov [#allocation9]   ;;  %s617_s23 = scalar_lea.hbm %s853_s3, 512 }
  0x25   :  { %s54_s19 = sshll.u32 %s695_s18, 4  ;;  %p618_p2 = scmp.ne.s32.totalorder %s853_s3, %s617_s23  ;;  %s55_s19 = int_to_ptr.vmem [resolvable:$true] %s54_s19 }
  0x26   :  { %p621_p3 = scmp.lt.u32.totalorder %s617_s23, %s853_s3 }
  0x28   :  { %p623_p4 = pnand %p621_p3, %p618_p2 }
  0x2a   :  { %626 = shalt.err (!%p623_p4)
}
  0x2b   :  { %s627_s28 = scalar_lea.vmem %s55_s19, 512  ;;  %p632_p6 = scmp.lt.s32.totalorder %s55_s19, %s55_s19 }
  0x2c   :  { %p628_p5 = scmp.ne.s32.totalorder %s55_s19, %s627_s28  ;;  %p633_p7 = scmp.lt.s32.totalorder %s627_s28, %s627_s28 }
  0x2e   :  { %p634_p8 = por %p633_p7, %p632_p6 }
  0x30   :  { %p635_p9 = pnand %p634_p8, %p628_p5 }
  0x32   :  { %638 = shalt.err (!%p635_p9)
}
  0x33   :  { %60 = dma.hbm_to_vmem [thread:$0]  %s853_s3, 512, %s55_s19, [#allocation8], %s693_s30, %s693_s30, %s694_s6  }
  0x34   :  { %683 = dma.done.wait [#allocation5], 512  }
  0x35   :  { %684 = vsyncadd [#allocation5], 4294966784 }
  0x36   :  { %685 = dma.done.wait [#allocation8], 2560  }
  0x37   :  { %686 = vsyncadd [#allocation8], 4294964736  ;;  %v85_v0 = vld [vmem:[#allocation7] sm:$0xff]  ;;  %v86_v1 = vld [vmem:[#allocation7 + $0x8] sm:$0xff]  ;;  %vm79_vm0 = vcmask 0   ;;  %v696_v32 = vmov 0.0  }
  0x38   :  { %v87_v2 = vld [vmem:[#allocation7 + $0x10] sm:$0xff]  ;;  %v481_v3 = vpack.c.bf16 %v86_v1, %v85_v0  ;;  %v88_v4 = vld [vmem:[#allocation7 + $0x18] sm:$0xff]  ;;  %v89_v6 = vld [vmem:[#allocation7 + $0x20] sm:$0xff]  ;;  %78 = vst [vmem:[#allocation2] sm:$0x1] %v696_v32  ;;  %vm374_vm1 = vcmask 1040384  }
  0x39   :  { %v485_v5 = vpack.c.bf16 %v88_v4, %v87_v2  ;;  %v90_v7 = vld [vmem:[#allocation7 + $0x28] sm:$0xff]  ;;  %v81_v9 = vld [vmem:[#allocation4] sm:$0xff]  ;;  %v83_v10 = vld [vmem:[#allocation4 + $0x10] sm:$0xff]  ;;  %80 = vst.msk [vmem:[#allocation3] sm:$0x1] %vm79_vm0, %v696_v32 }
  0x3a   :  { %482 = vmatprep.subr.bf16.mxu0 %v481_v3  ;;  %513 = vmatprep.subr.bf16.mxu1 %v481_v3  ;;  %v489_v8 = vpack.c.bf16 %v90_v7, %v89_v6  ;;  %v91_v11 = vld [vmem:[#allocation7 + $0x30] sm:$0xff]  ;;  %v92_v12 = vld [vmem:[#allocation7 + $0x38] sm:$0xff]  ;;  %v93_v14 = vld [vmem:[#allocation7 + $0x40] sm:$0xff] }
  0x3b   :  { %484 = vmatpush3.bf16.msra.mxu0 %v481_v3  ;;  %521 = vmatpush3.bf16.msra.mxu1 %v481_v3  ;;  %v493_v13 = vpack.c.bf16 %v92_v12, %v91_v11  ;;  %v94_v15 = vld [vmem:[#allocation7 + $0x48] sm:$0xff]  ;;  %v95_v17 = vld [vmem:[#allocation7 + $0x50] sm:$0xff]  ;;  %v96_v18 = vld [vmem:[#allocation7 + $0x58] sm:$0xff] }
  0x3c   :  { %486 = vmatprep.subr.bf16.mxu0 %v485_v5  ;;  %514 = vmatprep.subr.bf16.mxu1 %v485_v5  ;;  %v497_v16 = vpack.c.bf16 %v94_v15, %v93_v14  ;;  %v501_v19 = vpack.c.bf16 %v96_v18, %v95_v17  ;;  %v97_v20 = vld [vmem:[#allocation7 + $0x60] sm:$0xff]  ;;  %v98_v21 = vld [vmem:[#allocation7 + $0x68] sm:$0xff]  ;;  %v99_v23 = vld [vmem:[#allocation7 + $0x70] sm:$0xff] }
  0x3d   :  { %475 = vmatprep.mubr.f32.mxu0 %v81_v9  ;;  %478 = vmatprep.mubr.f32.mxu1 %v83_v10  ;;  %v505_v22 = vpack.c.bf16 %v98_v21, %v97_v20  ;;  %v100_v24 = vld [vmem:[#allocation7 + $0x78] sm:$0xff]  ;;  %v82_v26 = vld [vmem:[#allocation4 + $0x8] sm:$0xff]  ;;  %v102_v29 = vld [vmem:[#allocation9] sm:$0xff] }
  0x3e   :  { %v509_v25 = vpack.c.bf16 %v100_v24, %v99_v23  ;;  %v84_v27 = vld [vmem:[#allocation4 + $0x18] sm:$0xff]  ;;  %v103_v28 = vld [vmem:[#allocation9 + $0x8] sm:$0xff]  ;;  %v221_v31 = vmul.f32 %v102_v29, %v102_v29  ;;  %v104_v40 = vld [vmem:[#allocation9 + $0x10] sm:$0xff] }
  0x3f   :  { %488 = vmatpush3.bf16.msra.mxu0 %v485_v5  ;;  %522 = vmatpush3.bf16.msra.mxu1 %v485_v5  ;;  %v222_v30 = vmul.f32 %v103_v28, %v103_v28  ;;  %v422_v33 = vld [vmem:[%s852_s2] ss:$0 sm:$0xff]  ;;  %v223_v57 = vmul.f32 %v104_v40, %v104_v40  ;;  %s697_s2 = smov [#allocation10]  }
  0x40   :  { %490 = vmatprep.subr.bf16.mxu0 %v489_v8  ;;  %515 = vmatprep.subr.bf16.mxu1 %v489_v8  ;;  %v105_v46 = vld [vmem:[#allocation9 + $0x18] sm:$0xff]  ;;  %s398_s30 = sshll.u32 %s697_s2, 4  ;;  %s399_s30 = int_to_ptr.vmem [resolvable:$true] %s398_s30 }
  0x41   :  { %227 = vadd.xlane.f32.xlu0 %v222_v30  ;;  %225 = vadd.xlane.f32.xlu1 %v221_v31  ;;  %v224_v56 = vmul.f32 %v105_v46, %v105_v46  ;;  %v345_v6 = vld [vmem:[#allocation2] sm:$0x1]  ;;  %s639_s7 = scalar_lea.vmem %s399_s30, 128  ;;  %p644_p11 = scmp.lt.s32.totalorder %s399_s30, %s399_s30 }
  0x42   :  { %p640_p10 = scmp.ne.s32.totalorder %s399_s30, %s639_s7  ;;  %p645_p12 = scmp.lt.s32.totalorder %s639_s7, %s639_s7 }
  0x43   :  { %492 = vmatpush3.bf16.msra.mxu0 %v489_v8  ;;  %523 = vmatpush3.bf16.msra.mxu1 %v489_v8 }
  0x44   :  { %494 = vmatprep.subr.bf16.mxu0 %v493_v13  ;;  %516 = vmatprep.subr.bf16.mxu1 %v493_v13  ;;  %p646_p13 = por %p645_p12, %p644_p11 }
  0x46   :  { %p647_p0 = pnand %p646_p13, %p640_p10 }
  0x47   :  { %496 = vmatpush3.bf16.msra.mxu0 %v493_v13  ;;  %524 = vmatpush3.bf16.msra.mxu1 %v493_v13 }
  0x48   :  { %498 = vmatprep.subr.bf16.mxu0 %v497_v16  ;;  %517 = vmatprep.subr.bf16.mxu1 %v497_v16 }
  0x4b   :  { %500 = vmatpush3.bf16.msra.mxu0 %v497_v16  ;;  %525 = vmatpush3.bf16.msra.mxu1 %v497_v16 }
  0x4c   :  { %502 = vmatprep.subr.bf16.mxu0 %v501_v19  ;;  %518 = vmatprep.subr.bf16.mxu1 %v501_v19 }
  0x4f   :  { %504 = vmatpush3.bf16.msra.mxu0 %v501_v19  ;;  %526 = vmatpush3.bf16.msra.mxu1 %v501_v19 }
  0x50   :  { %506 = vmatprep.subr.bf16.mxu0 %v505_v22  ;;  %519 = vmatprep.subr.bf16.mxu1 %v505_v22 }
  0x53   :  { %508 = vmatpush3.bf16.msra.mxu0 %v505_v22  ;;  %527 = vmatpush3.bf16.msra.mxu1 %v505_v22 }
  0x54   :  { %510 = vmatprep.subr.bf16.mxu0 %v509_v25  ;;  %520 = vmatprep.subr.bf16.mxu1 %v509_v25 }
  0x57   :  { %512 = vmatpush3.bf16.msra.mxu0 %v509_v25  ;;  %528 = vmatpush3.bf16.msra.mxu1 %v509_v25 }
  0x5a   :  { %476 = vmatmul.mubr.f32.vlgmr.msra.gmra.mrb[0].mxu0 %v82_v26  ;;  %479 = vmatmul.mubr.f32.vlgmr.msra.gmra.mrb[0].mxu1 %v84_v27 }
  0xce   :  { %v228_v11 = vpop.xlane.xlu0 %227  ;;  %v226_v12 = vpop.xlane.xlu1 %225 }
  0xcf   :  { %v246_v15 = vmax.f32 %v228_v11, 1e-16  ;;  %v245_v22 = vmax.f32 %v226_v12, 1e-16 }
 0x12d   :  { %v477_v34 = vpop.f32.mrb[0].mxu0  ;;  %v480_v35 = vpop.f32.mrb[0].mxu1 }
 0x12e   :  { %v184_v36 = vadd.f32 %v477_v34, %v422_v33  ;;  %v194_v37 = vadd.f32 %v480_v35, %v422_v33  ;;  %v178_v38 = vpop.f32.mrb[1].mxu0  ;;  %v188_v39 = vpop.f32.mrb[1].mxu1 }
 0x12f   :  { %v179_v41 = vadd.f32 %v422_v33, %v178_v38  ;;  %v189_v42 = vadd.f32 %v422_v33, %v188_v39 }
 0x130   :  { %v338_v43 = vsub.f32 %v184_v36, %v103_v28  ;;  %v212_v44 = vmul.f32 %v194_v37, %v194_v37  ;;  %v210_v45 = vmul.f32 %v184_v36, %v184_v36  ;;  %v340_v51 = vsub.f32 %v194_v37, %v105_v46 }
 0x131   :  { %v337_v47 = vsub.f32 %v179_v41, %v102_v29  ;;  %v339_v48 = vsub.f32 %v189_v42, %v104_v40  ;;  %v211_v53 = vmul.f32 %v189_v42, %v189_v42  ;;  %v209_v54 = vmul.f32 %v179_v41, %v179_v41 }
 0x132   :  { %v342_v49 = vand.u32 2147483647, %v338_v43  ;;  %219 = vadd.xlane.f32.xlu1 %v212_v44  ;;  %215 = vadd.xlane.f32.xlu0 %v210_v45  ;;  %v344_v58 = vand.u32 2147483647, %v340_v51  ;;  %v198_v62 = vmul.f32 %v184_v36, %v103_v28  ;;  %v197_v63 = vmul.f32 %v179_v41, %v102_v29 }
 0x133   :  { %v341_v50 = vand.u32 2147483647, %v337_v47  ;;  %v343_v52 = vand.u32 2147483647, %v339_v48  ;;  %v200_v2 = vmul.f32 %v194_v37, %v105_v46  ;;  %v199_v3 = vmul.f32 %v189_v42, %v104_v40 }
 0x135   :  { %v346_v55 = vadd.f32 %v342_v49, %v341_v50 }
 0x136   :  { %217 = vadd.xlane.f32.xlu1 %v211_v53  ;;  %213 = vadd.xlane.f32.xlu0 %v209_v54 }
 0x137   :  { %v347_v59 = vadd.f32 %v346_v55, %v343_v52 }
 0x139   :  { %v348_v60 = vadd.f32 %v347_v59, %v344_v58 }
 0x13a   :  { %231 = vadd.xlane.f32.xlu1 %v224_v56  ;;  %229 = vadd.xlane.f32.xlu0 %v223_v57 }
 0x13b   :  { %v349_v61 = vrot.slane %v348_v60, 4 }
 0x13d   :  { %v350_v0 = vadd.f32 %v349_v61, %v348_v60 }
 0x13e   :  { %203 = vadd.xlane.f32.xlu1 %v198_v62  ;;  %201 = vadd.xlane.f32.xlu0 %v197_v63 }
 0x13f   :  { %v351_v1 = vrot.slane %v350_v0, 2 }
 0x141   :  { %v352_v4 = vadd.f32 %v351_v1, %v350_v0 }
 0x142   :  { %207 = vadd.xlane.f32.xlu1 %v200_v2  ;;  %205 = vadd.xlane.f32.xlu0 %v199_v3 }
 0x143   :  { %v353_v5 = vrot.slane %v352_v4, 1 }
 0x145   :  { %v354_v7 = vadd.f32 %v353_v5, %v352_v4 }
 0x147   :  { %v355_v8 = vadd.f32 %v354_v7, %v345_v6 }
 0x149   :  { %356 = vst [vmem:[#allocation2] sm:$0x1] %v355_v8 }
 0x150   :  { %v373_v9 = vld [vmem:[#allocation2] sm:$0x1] }
 0x151   :  { %v375_v10 = vsel %vm374_vm1, %v373_v9, 0.0 }
 0x152   :  { %376 = vadd.xlane.f32.xlu0 %v375_v10 }
 0x1bf   :  { %v220_v13 = vpop.xlane.xlu1 %219  ;;  %v216_v14 = vpop.xlane.xlu0 %215 }
 0x1c0   :  { %v234_v16 = vmax.f32 %v216_v14, 1e-16  ;;  %v236_v17 = vmax.f32 %v220_v13, 1e-16 }
 0x1c2   :  { %541 = vrsqrt.f32 %v234_v16 }
 0x1c3   :  { %v218_v18 = vpop.xlane.xlu1 %217  ;;  %v214_v19 = vpop.xlane.xlu0 %213  ;;  %543 = vrsqrt.f32 %v246_v15 }
 0x1c4   :  { %v235_v20 = vmax.f32 %v218_v18, 1e-16  ;;  %v233_v21 = vmax.f32 %v214_v19, 1e-16  ;;  %545 = vrsqrt.f32 %v236_v17 }
 0x1c6   :  { %547 = vrsqrt.f32 %v235_v20 }
 0x1c7   :  { %549 = vrsqrt.f32 %v233_v21  ;;  %v232_v23 = vpop.xlane.xlu1 %231  ;;  %v230_v24 = vpop.xlane.xlu0 %229 }
 0x1c8   :  { %v248_v25 = vmax.f32 %v232_v23, 1e-16  ;;  %v247_v26 = vmax.f32 %v230_v24, 1e-16  ;;  %551 = vrsqrt.f32 %v245_v22 }
 0x1ca   :  { %553 = vrsqrt.f32 %v248_v25 }
 0x1cb   :  { %555 = vrsqrt.f32 %v247_v26  ;;  %v204_v27 = vpop.xlane.xlu1 %203  ;;  %v202_v28 = vpop.xlane.xlu0 %201 }
 0x1cc   :  { %v542_v29 = vpop.eup %541 }
 0x1cd   :  { %v544_v30 = vpop.eup %543  ;;  %v242_v31 = vmul.f32 %v542_v29, %v204_v27 }
 0x1ce   :  { %v546_v32 = vpop.eup %545 }
 0x1cf   :  { %v254_v34 = vmul.f32 %v544_v30, %v242_v31  ;;  %v208_v35 = vpop.xlane.xlu1 %207  ;;  %v206_v37 = vpop.xlane.xlu0 %205 }
 0x1d0   :  { %v548_v33 = vpop.eup %547  ;;  %v244_v41 = vmul.f32 %v546_v32, %v208_v35 }
 0x1d1   :  { %v550_v36 = vpop.eup %549  ;;  %v785_v38 = vsub.f32 0.0, %v254_v34  ;;  %v243_v45 = vmul.f32 %v548_v33, %v206_v37 }
 0x1d2   :  { %v241_v39 = vmul.f32 %v550_v36, %v202_v28  ;;  %v552_v40 = vpop.eup %551 }
 0x1d3   :  { %v788_v43 = vsub.f32 0.0, %v785_v38  ;;  %v262_v33 = vmax.f32 %v785_v38, 0.0 }
 0x1d4   :  { %v554_v42 = vpop.eup %553  ;;  %v253_v44 = vmul.f32 %v552_v40, %v241_v39 }
 0x1d5   :  { %v556_v46 = vpop.eup %555  ;;  %v256_v47 = vmul.f32 %v554_v42, %v244_v41  ;;  %v278_v48 = vand.u32 2147483647, %v788_v43  ;;  %vm270_vm4 = vcmp.ne.f32.partialorder %v788_v43, %v788_v43 }
 0x1d6   :  { %v791_v49 = vsub.f32 0.0, %v253_v44  ;;  %v255_v50 = vmul.f32 %v556_v46, %v243_v45 }
 0x1d7   :  { %v793_v51 = vsub.f32 0.0, %v256_v47  ;;  %v282_v52 = vsub.f32 0.0, %v278_v48 }
 0x1d8   :  { %v796_v53 = vsub.f32 0.0, %v791_v49  ;;  %v798_v54 = vsub.f32 0.0, %v255_v50  ;;  %v261_v36 = vmax.f32 %v791_v49, 0.0 }
 0x1d9   :  { %v801_v55 = vsub.f32 0.0, %v793_v51  ;;  %v287_v56 = vmul.f32 1.442695, %v282_v52 }
 0x1da   :  { %v277_v57 = vand.u32 2147483647, %v796_v53  ;;  %v806_v59 = vsub.f32 0.0, %v798_v54  ;;  %vm269_vm6 = vcmp.ne.f32.partialorder %v796_v53, %v796_v53 }
 0x1db   :  { %v280_v58 = vand.u32 2147483647, %v801_v55  ;;  %557 = vpow2.f32 %v287_v56  ;;  %v264_v56 = vmax.f32 %v793_v51, 0.0  ;;  %vm272_vm9 = vcmp.ne.f32.partialorder %v801_v55, %v801_v55 }
 0x1dc   :  { %v281_v60 = vsub.f32 0.0, %v277_v57  ;;  %v279_v62 = vand.u32 2147483647, %v806_v59  ;;  %v263_v57 = vmax.f32 %v798_v54, 0.0  ;;  %vm271_vm8 = vcmp.ne.f32.partialorder %v806_v59, %v806_v59 }
 0x1dd   :  { %v284_v61 = vsub.f32 0.0, %v280_v58 }
 0x1de   :  { %v285_v63 = vmul.f32 1.442695, %v281_v60  ;;  %v283_v1 = vsub.f32 0.0, %v279_v62 }
 0x1df   :  { %v291_v0 = vmul.f32 1.442695, %v284_v61  ;;  %v377_v2 = vpop.xlane.xlu0 %376 }
 0x1e0   :  { %559 = vpow2.f32 %v285_v63  ;;  %v378_v3 = vrot.slane %v377_v2, 4  ;;  %v289_v4 = vmul.f32 1.442695, %v283_v1 }
 0x1e1   :  { %561 = vpow2.f32 %v291_v0 }
 0x1e2   :  { %v379_v5 = vadd.f32 %v378_v3, %v377_v2  ;;  %563 = vpow2.f32 %v289_v4 }
 0x1e4   :  { %v380_v6 = vrot.slane %v379_v5, 2 }
 0x1e5   :  { %v558_v7 = vpop.eup %557 }
 0x1e6   :  { %v381_v8 = vadd.f32 %v380_v6, %v379_v5  ;;  %v302_v9 = vadd.f32 1.0, %v558_v7  ;;  %v305_v15 = vmul.f32 -0.5, %v558_v7  ;;  %v308_v21 = vand.u32 2147483647, %v558_v7  ;;  %v357_v6 = vld [vmem:[#allocation3] sm:$0x1] }
 0x1e8   :  { %v382_v10 = vrot.slane %v381_v8, 1  ;;  %565 = vlog2.f32 %v302_v9  ;;  %v306_v19 = vadd.f32 1.0, %v305_v15  ;;  %vm309_vm2 = vcmp.lt.f32.partialorder %v308_v21, 0.0004427343 }
 0x1ea   :  { %v560_v11 = vpop.eup %559  ;;  %v383_v12 = vadd.f32 %v382_v10, %v381_v8  ;;  %v307_v26 = vmul.f32 %v558_v7, %v306_v19 }
 0x1eb   :  { %v562_v13 = vpop.eup %561  ;;  %v293_v14 = vadd.f32 1.0, %v560_v11  ;;  %v296_v20 = vmul.f32 -0.5, %v560_v11  ;;  %v299_v28 = vand.u32 2147483647, %v560_v11 }
 0x1ec   :  { %v320_v16 = vadd.f32 1.0, %v562_v13  ;;  %529 = vpush %v383_v12  ;;  %v564_v17 = vpop.eup %563  ;;  %v323_v22 = vmul.f32 -0.5, %v562_v13  ;;  %v326_v31 = vand.u32 2147483647, %v562_v13 }
 0x1ed   :  { %567 = vlog2.f32 %v293_v14  ;;  %v311_v18 = vadd.f32 1.0, %v564_v17  ;;  %v314_v24 = vmul.f32 -0.5, %v564_v17  ;;  %v297_v27 = vadd.f32 1.0, %v296_v20 }
 0x1ee   :  { %569 = vlog2.f32 %v320_v16  ;;  %v324_v29 = vadd.f32 1.0, %v323_v22  ;;  %v317_v40 = vand.u32 2147483647, %v564_v17  ;;  %vm300_vm3 = vcmp.lt.f32.partialorder %v299_v28, 0.0004427343 }
 0x1ef   :  { %571 = vlog2.f32 %v311_v18  ;;  %v315_v34 = vadd.f32 1.0, %v314_v24  ;;  %v298_v39 = vmul.f32 %v560_v11, %v297_v27  ;;  %vm327_vm5 = vcmp.lt.f32.partialorder %v326_v31, 0.0004427343 }
 0x1f0   :  { %v325_v44 = vmul.f32 %v562_v13, %v324_v29  ;;  %vm318_vm7 = vcmp.lt.f32.partialorder %v317_v40, 0.0004427343 }
 0x1f1   :  { %v316_v52 = vmul.f32 %v564_v17, %v315_v34 }
 0x1f2   :  { %v566_v23 = vpop.eup %565 }
 0x1f3   :  { %v304_v25 = vmul.f32 0.6931472, %v566_v23 }
 0x1f5   :  { %v310_v30 = vsel %vm309_vm2, %v307_v26, %v304_v25 }
 0x1f6   :  { %v330_v41 = vadd.f32 %v310_v30, %v262_v33 }
 0x1f7   :  { %v568_v32 = vpop.eup %567 }
 0x1f8   :  { %v570_v35 = vpop.eup %569  ;;  %v295_v37 = vmul.f32 0.6931472, %v568_v32  ;;  %v334_v58 = vsel %vm270_vm4, %v785_v38, %v330_v41 }
 0x1f9   :  { %v322_v42 = vmul.f32 0.6931472, %v570_v35  ;;  %v572_v45 = vpop.eup %571 }
 0x1fa   :  { %v301_v46 = vsel %vm300_vm3, %v298_v39, %v295_v37  ;;  %v313_v50 = vmul.f32 0.6931472, %v572_v45 }
 0x1fb   :  { %v329_v47 = vadd.f32 %v301_v46, %v261_v36  ;;  %v328_v48 = vsel %vm327_vm5, %v325_v44, %v322_v42 }
 0x1fc   :  { %v319_v61 = vsel %vm318_vm7, %v316_v52, %v313_v50  ;;  %v332_v62 = vadd.f32 %v328_v48, %v264_v56 }
 0x1fd   :  { %v333_v60 = vsel %vm269_vm6, %v791_v49, %v329_v47  ;;  %v331_v63 = vadd.f32 %v319_v61, %v263_v57 }
 0x1fe   :  { %v358_v43 = vadd.f32 %v334_v58, %v333_v60  ;;  %v336_v1 = vsel %vm272_vm9, %v793_v51, %v332_v62 }
 0x1ff   :  { %v335_v0 = vsel %vm271_vm8, %v798_v54, %v331_v63 }
 0x200   :  { %v359_v53 = vadd.f32 %v358_v43, %v335_v0 }
 0x202   :  { %v360_v2 = vadd.f32 %v359_v53, %v336_v1 }
 0x204   :  { %v361_v3 = vrot.slane %v360_v2, 4 }
 0x206   :  { %v362_v38 = vadd.f32 %v361_v3, %v360_v2 }
 0x208   :  { %v363_v4 = vrot.slane %v362_v38, 2 }
 0x20a   :  { %v364_v49 = vadd.f32 %v363_v4, %v362_v38 }
 0x20c   :  { %v365_v5 = vrot.slane %v364_v49, 1 }
 0x20e   :  { %v366_v7 = vadd.f32 %v365_v5, %v364_v49 }
 0x210   :  { %v367_v8 = vadd.f32 %v366_v7, %v357_v6 }
 0x212   :  { %369 = vst.msk [vmem:[#allocation3] sm:$0x1] %vm79_vm0, %v367_v8 }
 0x219   :  { %v387_v59 = vld [vmem:[#allocation3] sm:$0x1] }
 0x21a   :  { %531 = vpush %v387_v59 }
 0x21d   :  { %s530_s6 = spop %529 }
 0x21e   :  { %v385_v54 = vstv %s530_s6 }
 0x21f   :  { %386 = vst [vmem:[#allocation10] sm:$0xff] %v385_v54 }
 0x220   :  { %650 = shalt.err (!%p647_p0)
}
 0x221   :  { %s651_s10 = scalar_lea.hbm %s854_s4, 128 }
 0x222   :  { %p652_p1 = scmp.ne.s32.totalorder %s854_s4, %s651_s10  ;;  %p655_p2 = scmp.lt.u32.totalorder %s651_s10, %s854_s4 }
 0x224   :  { %p657_p3 = pnand %p655_p2, %p652_p1 }
 0x226   :  { %660 = shalt.err (!%p657_p3)
}
 0x227   :  { %401 = dma.vmem_to_hbm [thread:$0]  %s399_s30, 128, %s854_s4, [#allocation6]  }
 0x228   :  { %s698_s1 = smov [#allocation11]  }
 0x229   :  { %s408_s17 = sshll.u32 %s698_s1, 4  ;;  %s409_s17 = int_to_ptr.vmem [resolvable:$true] %s408_s17 }
 0x22a   :  { %s661_s19 = scalar_lea.vmem %s409_s17, 128  ;;  %p666_p5 = scmp.lt.s32.totalorder %s409_s17, %s409_s17 }
 0x22b   :  { %p662_p4 = scmp.ne.s32.totalorder %s409_s17, %s661_s19  ;;  %p667_p6 = scmp.lt.s32.totalorder %s661_s19, %s661_s19 }
 0x22d   :  { %p668_p7 = por %p667_p6, %p666_p5 }
 0x22f   :  { %p669_p8 = pnand %p668_p7, %p662_p4 }
 0x24b   :  { %s532_s18 = spop %531 }
 0x24c   :  { %v390_v51 = vstv %s532_s18 }
 0x24d   :  { %391 = vst [vmem:[#allocation11] sm:$0xff] %v390_v51 }
 0x24e   :  { %672 = shalt.err (!%p669_p8)
}
 0x24f   :  { %s673_s23 = scalar_lea.hbm %s855_s5, 128 }
 0x250   :  { %p674_p9 = scmp.ne.s32.totalorder %s855_s5, %s673_s23  ;;  %p677_p10 = scmp.lt.u32.totalorder %s673_s23, %s855_s5 }
 0x252   :  { %p679_p11 = pnand %p677_p10, %p674_p9 }
 0x254   :  { %682 = shalt.err (!%p679_p11)
}
 0x255   :  { %411 = dma.vmem_to_hbm [thread:$0]  %s409_s17, 128, %s855_s5, [#allocation12]  }
 0x256   :  { %687 = dma.done.wait [#allocation6], 128  }
 0x257   :  { %688 = vsyncadd [#allocation6], 4294967168 }
 0x258   :  { %689 = dma.done.wait [#allocation12], 128  }
 0x259   :  { %690 = vsyncadd [#allocation12], 4294967168 }
 0x25a   :  { %418 = vsyncpa [#allocation5], 1 }
 0x25b   :  { %419 = vsyncpa [#allocation8], 1 }
 0x25c   :  { %420 = vsyncpa [#allocation6], 1 }
 0x25d   :  { %421 = vsyncpa [#allocation12], 1 }

// kernel: tpu_custom_call.1
= control target key start
LH: loop header
LB: loop body
LE: loop exit
PB: predicated region body
PF: predicated region fallthrough
CT: control target
= control target key end

     0   :  { %11 = vsyncpa [#allocation5], 0  ;;  %s850_s0 = inlined_call_operand.hbm [shape: f32[32,128], index: 0, kind: input, shape index: {}]   ;;  %s851_s1 = inlined_call_operand.hbm [shape: f32[128,128], index: 1, kind: input, shape index: {}]   ;;  %s852_s2 = inlined_call_operand.vmem [shape: f32[1,128], index: 2, kind: input, shape index: {}]   ;;  %s853_s3 = inlined_call_operand.hbm [shape: f32[32,128], index: 3, kind: input, shape index: {}]   ;;  %s854_s4 = inlined_call_operand.hbm [shape: f32[1,8,128], index: 4, kind: output, shape index: {0}]   ;;  %s855_s5 = inlined_call_operand.hbm [shape: f32[1,8,128], index: 5, kind: output, shape index: {1}]  }
   0x1   :  { %12 = vsyncpa [#allocation8], 0 }
   0x2   :  { %13 = vsyncpa [#allocation6], 0 }
   0x3   :  { %14 = vsyncpa [#allocation12], 0  ;;  %s691_s18 = smov [#allocation7]   ;;  %s692_s20 = smov [#allocation4]  }
   0x4   :  { %s36_s19 = sshll.u32 %s691_s18, 4  ;;  %s24_s21 = sshll.u32 %s692_s20, 4  ;;  %s37_s19 = int_to_ptr.vmem [resolvable:$true] %s36_s19  ;;  %s729_s21 = int_to_ptr.vmem [resolvable:$true] %s24_s21 }
   0x5   :  { %s573_s24 = scalar_lea.hbm %s851_s1, 2048 }
   0x6   :  { %p574_p0 = scmp.ne.s32.totalorder %s851_s1, %s573_s24  ;;  %p577_p1 = scmp.lt.u32.totalorder %s573_s24, %s851_s1 }
   0x8   :  { %p579_p2 = pnand %p577_p1, %p574_p0 }
   0xa   :  { %582 = shalt.err (!%p579_p2)
}
   0xb   :  { %s583_s29 = scalar_lea.vmem %s37_s19, 2048  ;;  %p588_p4 = scmp.lt.s32.totalorder %s37_s19, %s37_s19 }
   0xc   :  { %p584_p3 = scmp.ne.s32.totalorder %s37_s19, %s583_s29  ;;  %p589_p5 = scmp.lt.s32.totalorder %s583_s29, %s583_s29 }
   0xe   :  { %p590_p6 = por %p589_p5, %p588_p4 }
  0x10   :  { %p591_p7 = pnand %p590_p6, %p584_p3 }
  0x12   :  { %594 = shalt.err (!%p591_p7)
}
  0x13   :  { %s693_s30 = smov 128   ;;  %s694_s6 = smov 8  }
  0x14   :  { %42 = dma.hbm_to_vmem [thread:$0]  %s851_s1, 2048, %s37_s19, [#allocation8], %s693_s30, %s693_s30, %s694_s6  }
  0x15   :  { %s595_s11 = scalar_lea.hbm %s850_s0, 512 }
  0x16   :  { %p596_p8 = scmp.ne.s32.totalorder %s850_s0, %s595_s11  ;;  %p599_p9 = scmp.lt.u32.totalorder %s595_s11, %s850_s0 }
  0x18   :  { %p601_p10 = pnand %p599_p9, %p596_p8 }
  0x1a   :  { %604 = shalt.err (!%p601_p10)
}
  0x1b   :  { %s605_s16 = scalar_lea.vmem %s729_s21, 512  ;;  %p610_p12 = scmp.lt.s32.totalorder %s729_s21, %s729_s21 }
  0x1c   :  { %p606_p11 = scmp.ne.s32.totalorder %s729_s21, %s605_s16  ;;  %p611_p13 = scmp.lt.s32.totalorder %s605_s16, %s605_s16 }
  0x1e   :  { %p612_p0 = por %p611_p13, %p610_p12 }
  0x20   :  { %p613_p1 = pnand %p612_p0, %p606_p11 }
  0x22   :  { %616 = shalt.err (!%p613_p1)
}
  0x23   :  { %30 = dma.hbm_to_vmem [thread:$0]  %s850_s0, 512, %s729_s21, [#allocation5], %s693_s30, %s693_s30, %s694_s6  }
  0x24   :  { %s695_s18 = smov [#allocation9]   ;;  %s617_s23 = scalar_lea.hbm %s853_s3, 512 }
  0x25   :  { %s54_s19 = sshll.u32 %s695_s18, 4  ;;  %p618_p2 = scmp.ne.s32.totalorder %s853_s3, %s617_s23  ;;  %s55_s19 = int_to_ptr.vmem [resolvable:$true] %s54_s19 }
  0x26   :  { %p621_p3 = scmp.lt.u32.totalorder %s617_s23, %s853_s3 }
  0x28   :  { %p623_p4 = pnand %p621_p3, %p618_p2 }
  0x2a   :  { %626 = shalt.err (!%p623_p4)
}
  0x2b   :  { %s627_s28 = scalar_lea.vmem %s55_s19, 512  ;;  %p632_p6 = scmp.lt.s32.totalorder %s55_s19, %s55_s19 }
  0x2c   :  { %p628_p5 = scmp.ne.s32.totalorder %s55_s19, %s627_s28  ;;  %p633_p7 = scmp.lt.s32.totalorder %s627_s28, %s627_s28 }
  0x2e   :  { %p634_p8 = por %p633_p7, %p632_p6 }
  0x30   :  { %p635_p9 = pnand %p634_p8, %p628_p5 }
  0x32   :  { %638 = shalt.err (!%p635_p9)
}
  0x33   :  { %60 = dma.hbm_to_vmem [thread:$0]  %s853_s3, 512, %s55_s19, [#allocation8], %s693_s30, %s693_s30, %s694_s6  }
  0x34   :  { %683 = dma.done.wait [#allocation5], 512  }
  0x35   :  { %684 = vsyncadd [#allocation5], 4294966784 }
  0x36   :  { %685 = dma.done.wait [#allocation8], 2560  }
  0x37   :  { %686 = vsyncadd [#allocation8], 4294964736  ;;  %v85_v0 = vld [vmem:[#allocation7] sm:$0xff]  ;;  %v86_v1 = vld [vmem:[#allocation7 + $0x8] sm:$0xff]  ;;  %vm79_vm0 = vcmask 0   ;;  %v696_v32 = vmov 0.0  }
  0x38   :  { %v87_v2 = vld [vmem:[#allocation7 + $0x10] sm:$0xff]  ;;  %v481_v3 = vpack.c.bf16 %v86_v1, %v85_v0  ;;  %v88_v4 = vld [vmem:[#allocation7 + $0x18] sm:$0xff]  ;;  %v89_v6 = vld [vmem:[#allocation7 + $0x20] sm:$0xff]  ;;  %78 = vst [vmem:[#allocation2] sm:$0x1] %v696_v32  ;;  %vm374_vm1 = vcmask 1040384  }
  0x39   :  { %v485_v5 = vpack.c.bf16 %v88_v4, %v87_v2  ;;  %v90_v7 = vld [vmem:[#allocation7 + $0x28] sm:$0xff]  ;;  %v81_v9 = vld [vmem:[#allocation4] sm:$0xff]  ;;  %v83_v10 = vld [vmem:[#allocation4 + $0x10] sm:$0xff]  ;;  %80 = vst.msk [vmem:[#allocation3] sm:$0x1] %vm79_vm0, %v696_v32 }
  0x3a   :  { %482 = vmatprep.subr.bf16.mxu0 %v481_v3  ;;  %513 = vmatprep.subr.bf16.mxu1 %v481_v3  ;;  %v489_v8 = vpack.c.bf16 %v90_v7, %v89_v6  ;;  %v91_v11 = vld [vmem:[#allocation7 + $0x30] sm:$0xff]  ;;  %v92_v12 = vld [vmem:[#allocation7 + $0x38] sm:$0xff]  ;;  %v93_v14 = vld [vmem:[#allocation7 + $0x40] sm:$0xff] }
  0x3b   :  { %484 = vmatpush3.bf16.msra.mxu0 %v481_v3  ;;  %521 = vmatpush3.bf16.msra.mxu1 %v481_v3  ;;  %v493_v13 = vpack.c.bf16 %v92_v12, %v91_v11  ;;  %v94_v15 = vld [vmem:[#allocation7 + $0x48] sm:$0xff]  ;;  %v95_v17 = vld [vmem:[#allocation7 + $0x50] sm:$0xff]  ;;  %v96_v18 = vld [vmem:[#allocation7 + $0x58] sm:$0xff] }
  0x3c   :  { %486 = vmatprep.subr.bf16.mxu0 %v485_v5  ;;  %514 = vmatprep.subr.bf16.mxu1 %v485_v5  ;;  %v497_v16 = vpack.c.bf16 %v94_v15, %v93_v14  ;;  %v501_v19 = vpack.c.bf16 %v96_v18, %v95_v17  ;;  %v97_v20 = vld [vmem:[#allocation7 + $0x60] sm:$0xff]  ;;  %v98_v21 = vld [vmem:[#allocation7 + $0x68] sm:$0xff]  ;;  %v99_v23 = vld [vmem:[#allocation7 + $0x70] sm:$0xff] }
  0x3d   :  { %475 = vmatprep.mubr.f32.mxu0 %v81_v9  ;;  %478 = vmatprep.mubr.f32.mxu1 %v83_v10  ;;  %v505_v22 = vpack.c.bf16 %v98_v21, %v97_v20  ;;  %v100_v24 = vld [vmem:[#allocation7 + $0x78] sm:$0xff]  ;;  %v82_v26 = vld [vmem:[#allocation4 + $0x8] sm:$0xff]  ;;  %v102_v29 = vld [vmem:[#allocation9] sm:$0xff] }
  0x3e   :  { %v509_v25 = vpack.c.bf16 %v100_v24, %v99_v23  ;;  %v84_v27 = vld [vmem:[#allocation4 + $0x18] sm:$0xff]  ;;  %v103_v28 = vld [vmem:[#allocation9 + $0x8] sm:$0xff]  ;;  %v221_v31 = vmul.f32 %v102_v29, %v102_v29  ;;  %v104_v40 = vld [vmem:[#allocation9 + $0x10] sm:$0xff] }
  0x3f   :  { %488 = vmatpush3.bf16.msra.mxu0 %v485_v5  ;;  %522 = vmatpush3.bf16.msra.mxu1 %v485_v5  ;;  %v222_v30 = vmul.f32 %v103_v28, %v103_v28  ;;  %v422_v33 = vld [vmem:[%s852_s2] ss:$0 sm:$0xff]  ;;  %v223_v57 = vmul.f32 %v104_v40, %v104_v40  ;;  %s697_s2 = smov [#allocation10]  }
  0x40   :  { %490 = vmatprep.subr.bf16.mxu0 %v489_v8  ;;  %515 = vmatprep.subr.bf16.mxu1 %v489_v8  ;;  %v105_v46 = vld [vmem:[#allocation9 + $0x18] sm:$0xff]  ;;  %s398_s30 = sshll.u32 %s697_s2, 4  ;;  %s399_s30 = int_to_ptr.vmem [resolvable:$true] %s398_s30 }
  0x41   :  { %227 = vadd.xlane.f32.xlu0 %v222_v30  ;;  %225 = vadd.xlane.f32.xlu1 %v221_v31  ;;  %v224_v56 = vmul.f32 %v105_v46, %v105_v46  ;;  %v345_v6 = vld [vmem:[#allocation2] sm:$0x1]  ;;  %s639_s7 = scalar_lea.vmem %s399_s30, 128  ;;  %p644_p11 = scmp.lt.s32.totalorder %s399_s30, %s399_s30 }
  0x42   :  { %p640_p10 = scmp.ne.s32.totalorder %s399_s30, %s639_s7  ;;  %p645_p12 = scmp.lt.s32.totalorder %s639_s7, %s639_s7 }
  0x43   :  { %492 = vmatpush3.bf16.msra.mxu0 %v489_v8  ;;  %523 = vmatpush3.bf16.msra.mxu1 %v489_v8 }
  0x44   :  { %494 = vmatprep.subr.bf16.mxu0 %v493_v13  ;;  %516 = vmatprep.subr.bf16.mxu1 %v493_v13  ;;  %p646_p13 = por %p645_p12, %p644_p11 }
  0x46   :  { %p647_p0 = pnand %p646_p13, %p640_p10 }
  0x47   :  { %496 = vmatpush3.bf16.msra.mxu0 %v493_v13  ;;  %524 = vmatpush3.bf16.msra.mxu1 %v493_v13 }
  0x48   :  { %498 = vmatprep.subr.bf16.mxu0 %v497_v16  ;;  %517 = vmatprep.subr.bf16.mxu1 %v497_v16 }
  0x4b   :  { %500 = vmatpush3.bf16.msra.mxu0 %v497_v16  ;;  %525 = vmatpush3.bf16.msra.mxu1 %v497_v16 }
  0x4c   :  { %502 = vmatprep.subr.bf16.mxu0 %v501_v19  ;;  %518 = vmatprep.subr.bf16.mxu1 %v501_v19 }
  0x4f   :  { %504 = vmatpush3.bf16.msra.mxu0 %v501_v19  ;;  %526 = vmatpush3.bf16.msra.mxu1 %v501_v19 }
  0x50   :  { %506 = vmatprep.subr.bf16.mxu0 %v505_v22  ;;  %519 = vmatprep.subr.bf16.mxu1 %v505_v22 }
  0x53   :  { %508 = vmatpush3.bf16.msra.mxu0 %v505_v22  ;;  %527 = vmatpush3.bf16.msra.mxu1 %v505_v22 }
  0x54   :  { %510 = vmatprep.subr.bf16.mxu0 %v509_v25  ;;  %520 = vmatprep.subr.bf16.mxu1 %v509_v25 }
  0x57   :  { %512 = vmatpush3.bf16.msra.mxu0 %v509_v25  ;;  %528 = vmatpush3.bf16.msra.mxu1 %v509_v25 }
  0x5a   :  { %476 = vmatmul.mubr.f32.vlgmr.msra.gmra.mrb[0].mxu0 %v82_v26  ;;  %479 = vmatmul.mubr.f32.vlgmr.msra.gmra.mrb[0].mxu1 %v84_v27 }
  0xce   :  { %v228_v11 = vpop.xlane.xlu0 %227  ;;  %v226_v12 = vpop.xlane.xlu1 %225 }
  0xcf   :  { %v246_v15 = vmax.f32 %v228_v11, 1e-16  ;;  %v245_v22 = vmax.f32 %v226_v12, 1e-16 }
 0x12d   :  { %v477_v34 = vpop.f32.mrb[0].mxu0  ;;  %v480_v35 = vpop.f32.mrb[0].mxu1 }
 0x12e   :  { %v184_v36 = vadd.f32 %v477_v34, %v422_v33  ;;  %v194_v37 = vadd.f32 %v480_v35, %v422_v33  ;;  %v178_v38 = vpop.f32.mrb[1].mxu0  ;;  %v188_v39 = vpop.f32.mrb[1].mxu1 }
 0x12f   :  { %v179_v41 = vadd.f32 %v422_v33, %v178_v38  ;;  %v189_v42 = vadd.f32 %v422_v33, %v188_v39 }
 0x130   :  { %v338_v43 = vsub.f32 %v184_v36, %v103_v28  ;;  %v212_v44 = vmul.f32 %v194_v37, %v194_v37  ;;  %v210_v45 = vmul.f32 %v184_v36, %v184_v36  ;;  %v340_v51 = vsub.f32 %v194_v37, %v105_v46 }
 0x131   :  { %v337_v47 = vsub.f32 %v179_v41, %v102_v29  ;;  %v339_v48 = vsub.f32 %v189_v42, %v104_v40  ;;  %v211_v53 = vmul.f32 %v189_v42, %v189_v42  ;;  %v209_v54 = vmul.f32 %v179_v41, %v179_v41 }
 0x132   :  { %v342_v49 = vand.u32 2147483647, %v338_v43  ;;  %219 = vadd.xlane.f32.xlu1 %v212_v44  ;;  %215 = vadd.xlane.f32.xlu0 %v210_v45  ;;  %v344_v58 = vand.u32 2147483647, %v340_v51  ;;  %v198_v62 = vmul.f32 %v184_v36, %v103_v28  ;;  %v197_v63 = vmul.f32 %v179_v41, %v102_v29 }
 0x133   :  { %v341_v50 = vand.u32 2147483647, %v337_v47  ;;  %v343_v52 = vand.u32 2147483647, %v339_v48  ;;  %v200_v2 = vmul.f32 %v194_v37, %v105_v46  ;;  %v199_v3 = vmul.f32 %v189_v42, %v104_v40 }
 0x135   :  { %v346_v55 = vadd.f32 %v342_v49, %v341_v50 }
 0x136   :  { %217 = vadd.xlane.f32.xlu1 %v211_v53  ;;  %213 = vadd.xlane.f32.xlu0 %v209_v54 }
 0x137   :  { %v347_v59 = vadd.f32 %v346_v55, %v343_v52 }
 0x139   :  { %v348_v60 = vadd.f32 %v347_v59, %v344_v58 }
 0x13a   :  { %231 = vadd.xlane.f32.xlu1 %v224_v56  ;;  %229 = vadd.xlane.f32.xlu0 %v223_v57 }
 0x13b   :  { %v349_v61 = vrot.slane %v348_v60, 4 }
 0x13d   :  { %v350_v0 = vadd.f32 %v349_v61, %v348_v60 }
 0x13e   :  { %203 = vadd.xlane.f32.xlu1 %v198_v62  ;;  %201 = vadd.xlane.f32.xlu0 %v197_v63 }
 0x13f   :  { %v351_v1 = vrot.slane %v350_v0, 2 }
 0x141   :  { %v352_v4 = vadd.f32 %v351_v1, %v350_v0 }
 0x142   :  { %207 = vadd.xlane.f32.xlu1 %v200_v2  ;;  %205 = vadd.xlane.f32.xlu0 %v199_v3 }
 0x143   :  { %v353_v5 = vrot.slane %v352_v4, 1 }
 0x145   :  { %v354_v7 = vadd.f32 %v353_v5, %v352_v4 }
 0x147   :  { %v355_v8 = vadd.f32 %v354_v7, %v345_v6 }
 0x149   :  { %356 = vst [vmem:[#allocation2] sm:$0x1] %v355_v8 }
 0x150   :  { %v373_v9 = vld [vmem:[#allocation2] sm:$0x1] }
 0x151   :  { %v375_v10 = vsel %vm374_vm1, %v373_v9, 0.0 }
 0x152   :  { %376 = vadd.xlane.f32.xlu0 %v375_v10 }
 0x1bf   :  { %v220_v13 = vpop.xlane.xlu1 %219  ;;  %v216_v14 = vpop.xlane.xlu0 %215 }
 0x1c0   :  { %v234_v16 = vmax.f32 %v216_v14, 1e-16  ;;  %v236_v17 = vmax.f32 %v220_v13, 1e-16 }
 0x1c2   :  { %541 = vrsqrt.f32 %v234_v16 }
 0x1c3   :  { %v218_v18 = vpop.xlane.xlu1 %217  ;;  %v214_v19 = vpop.xlane.xlu0 %213  ;;  %543 = vrsqrt.f32 %v246_v15 }
 0x1c4   :  { %v235_v20 = vmax.f32 %v218_v18, 1e-16  ;;  %v233_v21 = vmax.f32 %v214_v19, 1e-16  ;;  %545 = vrsqrt.f32 %v236_v17 }
 0x1c6   :  { %547 = vrsqrt.f32 %v235_v20 }
 0x1c7   :  { %549 = vrsqrt.f32 %v233_v21  ;;  %v232_v23 = vpop.xlane.xlu1 %231  ;;  %v230_v24 = vpop.xlane.xlu0 %229 }
 0x1c8   :  { %v248_v25 = vmax.f32 %v232_v23, 1e-16  ;;  %v247_v26 = vmax.f32 %v230_v24, 1e-16  ;;  %551 = vrsqrt.f32 %v245_v22 }
 0x1ca   :  { %553 = vrsqrt.f32 %v248_v25 }
 0x1cb   :  { %555 = vrsqrt.f32 %v247_v26  ;;  %v204_v27 = vpop.xlane.xlu1 %203  ;;  %v202_v28 = vpop.xlane.xlu0 %201 }
 0x1cc   :  { %v542_v29 = vpop.eup %541 }
 0x1cd   :  { %v544_v30 = vpop.eup %543  ;;  %v242_v31 = vmul.f32 %v542_v29, %v204_v27 }
 0x1ce   :  { %v546_v32 = vpop.eup %545 }
 0x1cf   :  { %v254_v34 = vmul.f32 %v544_v30, %v242_v31  ;;  %v208_v35 = vpop.xlane.xlu1 %207  ;;  %v206_v37 = vpop.xlane.xlu0 %205 }
 0x1d0   :  { %v548_v33 = vpop.eup %547  ;;  %v244_v41 = vmul.f32 %v546_v32, %v208_v35 }
 0x1d1   :  { %v550_v36 = vpop.eup %549  ;;  %v785_v38 = vsub.f32 0.0, %v254_v34  ;;  %v243_v45 = vmul.f32 %v548_v33, %v206_v37 }
 0x1d2   :  { %v241_v39 = vmul.f32 %v550_v36, %v202_v28  ;;  %v552_v40 = vpop.eup %551 }
 0x1d3   :  { %v788_v43 = vsub.f32 0.0, %v785_v38  ;;  %v262_v33 = vmax.f32 %v785_v38, 0.0 }
 0x1d4   :  { %v554_v42 = vpop.eup %553  ;;  %v253_v44 = vmul.f32 %v552_v40, %v241_v39 }
 0x1d5   :  { %v556_v46 = vpop.eup %555  ;;  %v256_v47 = vmul.f32 %v554_v42, %v244_v41  ;;  %v278_v48 = vand.u32 2147483647, %v788_v43  ;;  %vm270_vm4 = vcmp.ne.f32.partialorder %v788_v43, %v788_v43 }
 0x1d6   :  { %v791_v49 = vsub.f32 0.0, %v253_v44  ;;  %v255_v50 = vmul.f32 %v556_v46, %v243_v45 }
 0x1d7   :  { %v793_v51 = vsub.f32 0.0, %v256_v47  ;;  %v282_v52 = vsub.f32 0.0, %v278_v48 }
 0x1d8   :  { %v796_v53 = vsub.f32 0.0, %v791_v49  ;;  %v798_v54 = vsub.f32 0.0, %v255_v50  ;;  %v261_v36 = vmax.f32 %v791_v49, 0.0 }
 0x1d9   :  { %v801_v55 = vsub.f32 0.0, %v793_v51  ;;  %v287_v56 = vmul.f32 1.442695, %v282_v52 }
 0x1da   :  { %v277_v57 = vand.u32 2147483647, %v796_v53  ;;  %v806_v59 = vsub.f32 0.0, %v798_v54  ;;  %vm269_vm6 = vcmp.ne.f32.partialorder %v796_v53, %v796_v53 }
 0x1db   :  { %v280_v58 = vand.u32 2147483647, %v801_v55  ;;  %557 = vpow2.f32 %v287_v56  ;;  %v264_v56 = vmax.f32 %v793_v51, 0.0  ;;  %vm272_vm9 = vcmp.ne.f32.partialorder %v801_v55, %v801_v55 }
 0x1dc   :  { %v281_v60 = vsub.f32 0.0, %v277_v57  ;;  %v279_v62 = vand.u32 2147483647, %v806_v59  ;;  %v263_v57 = vmax.f32 %v798_v54, 0.0  ;;  %vm271_vm8 = vcmp.ne.f32.partialorder %v806_v59, %v806_v59 }
 0x1dd   :  { %v284_v61 = vsub.f32 0.0, %v280_v58 }
 0x1de   :  { %v285_v63 = vmul.f32 1.442695, %v281_v60  ;;  %v283_v1 = vsub.f32 0.0, %v279_v62 }
 0x1df   :  { %v291_v0 = vmul.f32 1.442695, %v284_v61  ;;  %v377_v2 = vpop.xlane.xlu0 %376 }
 0x1e0   :  { %559 = vpow2.f32 %v285_v63  ;;  %v378_v3 = vrot.slane %v377_v2, 4  ;;  %v289_v4 = vmul.f32 1.442695, %v283_v1 }
 0x1e1   :  { %561 = vpow2.f32 %v291_v0 }
 0x1e2   :  { %v379_v5 = vadd.f32 %v378_v3, %v377_v2  ;;  %563 = vpow2.f32 %v289_v4 }
 0x1e4   :  { %v380_v6 = vrot.slane %v379_v5, 2 }
 0x1e5   :  { %v558_v7 = vpop.eup %557 }
 0x1e6   :  { %v381_v8 = vadd.f32 %v380_v6, %v379_v5  ;;  %v302_v9 = vadd.f32 1.0, %v558_v7  ;;  %v305_v15 = vmul.f32 -0.5, %v558_v7  ;;  %v308_v21 = vand.u32 2147483647, %v558_v7  ;;  %v357_v6 = vld [vmem:[#allocation3] sm:$0x1] }
 0x1e8   :  { %v382_v10 = vrot.slane %v381_v8, 1  ;;  %565 = vlog2.f32 %v302_v9  ;;  %v306_v19 = vadd.f32 1.0, %v305_v15  ;;  %vm309_vm2 = vcmp.lt.f32.partialorder %v308_v21, 0.0004427343 }
 0x1ea   :  { %v560_v11 = vpop.eup %559  ;;  %v383_v12 = vadd.f32 %v382_v10, %v381_v8  ;;  %v307_v26 = vmul.f32 %v558_v7, %v306_v19 }
 0x1eb   :  { %v562_v13 = vpop.eup %561  ;;  %v293_v14 = vadd.f32 1.0, %v560_v11  ;;  %v296_v20 = vmul.f32 -0.5, %v560_v11  ;;  %v299_v28 = vand.u32 2147483647, %v560_v11 }
 0x1ec   :  { %v320_v16 = vadd.f32 1.0, %v562_v13  ;;  %529 = vpush %v383_v12  ;;  %v564_v17 = vpop.eup %563  ;;  %v323_v22 = vmul.f32 -0.5, %v562_v13  ;;  %v326_v31 = vand.u32 2147483647, %v562_v13 }
 0x1ed   :  { %567 = vlog2.f32 %v293_v14  ;;  %v311_v18 = vadd.f32 1.0, %v564_v17  ;;  %v314_v24 = vmul.f32 -0.5, %v564_v17  ;;  %v297_v27 = vadd.f32 1.0, %v296_v20 }
 0x1ee   :  { %569 = vlog2.f32 %v320_v16  ;;  %v324_v29 = vadd.f32 1.0, %v323_v22  ;;  %v317_v40 = vand.u32 2147483647, %v564_v17  ;;  %vm300_vm3 = vcmp.lt.f32.partialorder %v299_v28, 0.0004427343 }
 0x1ef   :  { %571 = vlog2.f32 %v311_v18  ;;  %v315_v34 = vadd.f32 1.0, %v314_v24  ;;  %v298_v39 = vmul.f32 %v560_v11, %v297_v27  ;;  %vm327_vm5 = vcmp.lt.f32.partialorder %v326_v31, 0.0004427343 }
 0x1f0   :  { %v325_v44 = vmul.f32 %v562_v13, %v324_v29  ;;  %vm318_vm7 = vcmp.lt.f32.partialorder %v317_v40, 0.0004427343 }
 0x1f1   :  { %v316_v52 = vmul.f32 %v564_v17, %v315_v34 }
 0x1f2   :  { %v566_v23 = vpop.eup %565 }
 0x1f3   :  { %v304_v25 = vmul.f32 0.6931472, %v566_v23 }
 0x1f5   :  { %v310_v30 = vsel %vm309_vm2, %v307_v26, %v304_v25 }
 0x1f6   :  { %v330_v41 = vadd.f32 %v310_v30, %v262_v33 }
 0x1f7   :  { %v568_v32 = vpop.eup %567 }
 0x1f8   :  { %v570_v35 = vpop.eup %569  ;;  %v295_v37 = vmul.f32 0.6931472, %v568_v32  ;;  %v334_v58 = vsel %vm270_vm4, %v785_v38, %v330_v41 }
 0x1f9   :  { %v322_v42 = vmul.f32 0.6931472, %v570_v35  ;;  %v572_v45 = vpop.eup %571 }
 0x1fa   :  { %v301_v46 = vsel %vm300_vm3, %v298_v39, %v295_v37  ;;  %v313_v50 = vmul.f32 0.6931472, %v572_v45 }
 0x1fb   :  { %v329_v47 = vadd.f32 %v301_v46, %v261_v36  ;;  %v328_v48 = vsel %vm327_vm5, %v325_v44, %v322_v42 }
 0x1fc   :  { %v319_v61 = vsel %vm318_vm7, %v316_v52, %v313_v50  ;;  %v332_v62 = vadd.f32 %v328_v48, %v264_v56 }
 0x1fd   :  { %v333_v60 = vsel %vm269_vm6, %v791_v49, %v329_v47  ;;  %v331_v63 = vadd.f32 %v319_v61, %v263_v57 }
 0x1fe   :  { %v358_v43 = vadd.f32 %v334_v58, %v333_v60  ;;  %v336_v1 = vsel %vm272_vm9, %v793_v51, %v332_v62 }
 0x1ff   :  { %v335_v0 = vsel %vm271_vm8, %v798_v54, %v331_v63 }
 0x200   :  { %v359_v53 = vadd.f32 %v358_v43, %v335_v0 }
 0x202   :  { %v360_v2 = vadd.f32 %v359_v53, %v336_v1 }
 0x204   :  { %v361_v3 = vrot.slane %v360_v2, 4 }
 0x206   :  { %v362_v38 = vadd.f32 %v361_v3, %v360_v2 }
 0x208   :  { %v363_v4 = vrot.slane %v362_v38, 2 }
 0x20a   :  { %v364_v49 = vadd.f32 %v363_v4, %v362_v38 }
 0x20c   :  { %v365_v5 = vrot.slane %v364_v49, 1 }
 0x20e   :  { %v366_v7 = vadd.f32 %v365_v5, %v364_v49 }
 0x210   :  { %v367_v8 = vadd.f32 %v366_v7, %v357_v6 }
 0x212   :  { %369 = vst.msk [vmem:[#allocation3] sm:$0x1] %vm79_vm0, %v367_v8 }
 0x219   :  { %v387_v59 = vld [vmem:[#allocation3] sm:$0x1] }
 0x21a   :  { %531 = vpush %v387_v59 }
 0x21d   :  { %s530_s6 = spop %529 }
 0x21e   :  { %v385_v54 = vstv %s530_s6 }
 0x21f   :  { %386 = vst [vmem:[#allocation10] sm:$0xff] %v385_v54 }
 0x220   :  { %650 = shalt.err (!%p647_p0)
}
 0x221   :  { %s651_s10 = scalar_lea.hbm %s854_s4, 128 }
 0x222   :  { %p652_p1 = scmp.ne.s32.totalorder %s854_s4, %s651_s10  ;;  %p655_p2 = scmp.lt.u32.totalorder %s651_s10, %s854_s4 }
 0x224   :  { %p657_p3 = pnand %p655_p2, %p652_p1 }
 0x226   :  { %660 = shalt.err (!%p657_p3)
}
 0x227   :  { %401 = dma.vmem_to_hbm [thread:$0]  %s399_s30, 128, %s854_s4, [#allocation6]  }
 0x228   :  { %s698_s1 = smov [#allocation11]  }
 0x229   :  { %s408_s17 = sshll.u32 %s698_s1, 4  ;;  %s409_s17 = int_to_ptr.vmem [resolvable:$true] %s408_s17 }
 0x22a   :  { %s661_s19 = scalar_lea.vmem %s409_s17, 128  ;;  %p666_p5 = scmp.lt.s32.totalorder %s409_s17, %s409_s17 }
 0x22b   :  { %p662_p4 = scmp.ne.s32.totalorder %s409_s17, %s661_s19  ;;  %p667_p6 = scmp.lt.s32.totalorder %s661_s19, %s661_s19 }
 0x22d   :  { %p668_p7 = por %p667_p6, %p666_p5 }
 0x22f   :  { %p669_p8 = pnand %p668_p7, %p662_p4 }
 0x24b   :  { %s532_s18 = spop %531 }
 0x24c   :  { %v390_v51 = vstv %s532_s18 }
 0x24d   :  { %391 = vst [vmem:[#allocation11] sm:$0xff] %v390_v51 }
 0x24e   :  { %672 = shalt.err (!%p669_p8)
}
 0x24f   :  { %s673_s23 = scalar_lea.hbm %s855_s5, 128 }
 0x250   :  { %p674_p9 = scmp.ne.s32.totalorder %s855_s5, %s673_s23  ;;  %p677_p10 = scmp.lt.u32.totalorder %s673_s23, %s855_s5 }
 0x252   :  { %p679_p11 = pnand %p677_p10, %p674_p9 }
 0x254   :  { %682 = shalt.err (!%p679_p11)
}
 0x255   :  { %411 = dma.vmem_to_hbm [thread:$0]  %s409_s17, 128, %s855_s5, [#allocation12]  }
 0x256   :  { %687 = dma.done.wait [#allocation6], 128  }
 0x257   :  { %688 = vsyncadd [#allocation6], 4294967168 }
 0x258   :  { %689 = dma.done.wait [#allocation12], 128  }
 0x259   :  { %690 = vsyncadd [#allocation12], 4294967168 }
 0x25a   :  { %418 = vsyncpa [#allocation5], 1 }
 0x25b   :  { %419 = vsyncpa [#allocation8], 1 }
 0x25c   :  { %420 = vsyncpa [#allocation6], 1 }
 0x25d   :  { %421 = vsyncpa [#allocation12], 1 }

</bundles_post_ra>
